<compile_context>
chip_gen: v7x
topology: tpu7x:2x2x1
jax: 0.10.0
libtpu: 0.0.40
codegen_flags: <defaults>
</compile_context>

<pallas_src>
import jax
import jax.numpy as jnp
from jax.experimental import pallas as pl
from jax.experimental.pallas import tpu as pltpu


# ---------------------------------------------------------------------------
# Glue: PyTorch-style bilinear resize (align_corners=False, no antialias), NCHW
# ---------------------------------------------------------------------------
def _src_index(out_size: int, in_size: int):
    scale = in_size / out_size
    s = (jnp.arange(out_size, dtype=jnp.float32) + 0.5) * scale - 0.5
    s = jnp.maximum(s, 0.0)
    i0 = jnp.minimum(jnp.floor(s).astype(jnp.int32), in_size - 1)
    i1 = jnp.minimum(i0 + 1, in_size - 1)
    w1 = s - i0.astype(jnp.float32)
    return i0, i1, w1


def resize_bilinear_nchw(x, out_h: int, out_w: int):
    n, c, h, w = x.shape
    y0, y1, wy = _src_index(out_h, h)
    x0, x1, wx = _src_index(out_w, w)
    top = x[:, :, y0, :]
    bot = x[:, :, y1, :]
    rows = top * (1.0 - wy)[None, None, :, None] + bot * wy[None, None, :, None]
    left = rows[:, :, :, x0]
    right = rows[:, :, :, x1]
    return left * (1.0 - wx)[None, None, None, :] + right * wx[None, None, None, :]


# ---------------------------------------------------------------------------
# Helpers
# ---------------------------------------------------------------------------
def _round_up(x: int, m: int) -> int:
    return ((x + m - 1) // m) * m


def _choose_tile(l_pad: int, target: int) -> int:
    """Largest multiple of 128 that divides l_pad and is <= target (>=128)."""
    best = 128
    t = 128
    while t <= min(target, l_pad):
        if l_pad % t == 0:
            best = t
        t += 128
    return best


def _tpu_info():
    """(vmem_capacity_bytes, is_v5_class, is_v7_class) with safe fallbacks."""
    kind = ""
    try:
        kind = jax.devices()[0].device_kind.lower()
    except Exception:
        kind = ""
    vmem_cap = None
    try:
        vmem_cap = int(pltpu.get_tpu_info().vmem_capacity_bytes)
    except Exception:
        vmem_cap = None
    if vmem_cap is None:
        # Unknown -> assume the smaller (v7x-class) 64 MiB VMEM, conservative.
        vmem_cap = (64 << 20) if (("v7" in kind) or (kind == "")) else (128 << 20)
    is_v5 = "v5" in kind
    is_v7 = ("v7" in kind) or (vmem_cap <= (96 << 20) and ("v6" not in kind) and not is_v5)
    return vmem_cap, is_v5, is_v7


def _vmem_limit_bytes(c: int, c8p: int, tile_q: int, tile_m: int, vmem_cap: int) -> int:
    f32, bf16 = 4, 2
    per_step = (
        2 * c * tile_q * f32                            # x query block (dbl-buffered)
        + 2 * c * tile_m * bf16                         # x key block (bf16, dbl-buffered)
        + 2 * 3 * tile_q * f32                          # trimap query block
        + 2 * 3 * tile_m * f32                          # trimap key block
        + 2 * c * tile_q * f32                          # output accumulator block
        + 2 * (2 * 3 * c8p * c + 3 * c * c) * bf16      # stacked weights
        + 2 * (2 * 3 * c8p + 3 * c + 3) * f32           # biases + gamma
        + 3 * c8p * tile_q * bf16                       # q scratch
        + tile_m * tile_q * (f32 + 2 * bf16)            # energy block + bf16 copy + probs
        + (3 * c8p + 3 * c) * tile_m * f32              # kall / vall
        + 2 * c * tile_m * (f32 + bf16)                 # per-branch k/v temporaries
        + 3 * c8p * tile_q * f32                        # qall (mi == 0 only)
        + 2 * c * tile_q * f32                          # o_b + contrib
    )
    cap = int(vmem_cap * 0.80)                          # leave headroom for internal scratch
    return int(min(max(2 * per_step, 32 << 20), cap))


# ---------------------------------------------------------------------------
# Pallas kernel: tiled, fused 3-branch trimap sigmoid-attention + residual
# ---------------------------------------------------------------------------
def _make_trimap_attn_kernel(c: int, c8p: int, l_true: int, l_pad: int,
                             tile_m: int, bf16_probs: bool):
    need_mask = l_pad != l_true

    def kernel(xq_ref, xm_ref, triq_ref, trim_ref,
               wq_ref, bq_ref, wk_ref, bk_ref, wv_ref, bv_ref, gamma_ref,
               o_ref, q_scr):
        mi = pl.program_id(2)  # key-tile index (innermost reduction axis)

        # --- first key block of this (batch, query-tile): init residual + Q ---
        @pl.when(mi == 0)
        def _():
            x_q = xq_ref[0]                                      # (C, Lq) f32
            o_ref[0] = x_q                                       # residual accumulator
            # Stacked query projection for all 3 branches: (3*C8p, C) @ (C, Lq).
            qall = jnp.dot(wq_ref[...], x_q.astype(jnp.bfloat16),
                           preferred_element_type=jnp.float32)   # (3*C8p, Lq) f32
            tri_q = triq_ref[0]                                  # (3, Lq) f32
            for br in range(3):
                # Padded C8 rows have zero weights AND zero biases -> exactly zero.
                q_br = (tri_q[br:br + 1, :] * qall[br * c8p:(br + 1) * c8p, :]
                        + bq_ref[br])                            # (C8p, Lq) f32
                q_scr[br] = q_br.astype(jnp.bfloat16)

        # --- key / value projections for this key tile (3 branches stacked) ---
        x_m = xm_ref[0]                                          # (C, Lm) bf16 (precast)
        tri_m = trim_ref[0]                                      # (3, Lm) f32
        kall = jnp.dot(wk_ref[...], x_m, preferred_element_type=jnp.float32)  # (3*C8p, Lm)
        vall = jnp.dot(wv_ref[...], x_m, preferred_element_type=jnp.float32)  # (3*C,   Lm)

        if need_mask:
            gm = mi * tile_m + jax.lax.broadcasted_iota(jnp.int32, (1, tile_m), 1)
            vmask = (gm < l_true).astype(jnp.float32)            # (1, Lm) - kill padded keys

        contrib = None
        for br in range(3):
            t_m = tri_m[br:br + 1, :]                                          # (1, Lm)
            k_br = t_m * kall[br * c8p:(br + 1) * c8p, :] + bk_ref[br]          # (C8p, Lm)
            v_br = t_m * vall[br * c:(br + 1) * c, :] + bv_ref[br]              # (C, Lm)
            if need_mask:
                v_br = v_br * vmask
            # E[m, l] = sum_c k[c, m] * q[c, l]  (energy^T tile, transposed-LHS matmul).
            e = jax.lax.dot_general(
                k_br.astype(jnp.bfloat16), q_scr[br],
                dimension_numbers=(((0,), (0,)), ((), ())),
                preferred_element_type=jnp.float32)                             # (Lm, Lq)
            if bf16_probs:
                p = jax.nn.sigmoid(e.astype(jnp.bfloat16))                      # bf16 EUP path
            else:
                p = jax.nn.sigmoid(e).astype(jnp.bfloat16)                      # v5: f32 sigmoid
            o_b = jnp.dot(v_br.astype(jnp.bfloat16), p,
                          preferred_element_type=jnp.float32)                   # (C, Lq) f32
            o_b = gamma_ref[br] * o_b                                           # gamma in f32
            contrib = o_b if contrib is None else contrib + o_b

        o_ref[0] = o_ref[0] + contrib

    return kernel


# ---------------------------------------------------------------------------
# Wrapper
# ---------------------------------------------------------------------------
def self_attn_trimap_forward(x, trimap, params):
    """x: (N, C, H, W) f32; trimap: (N, 3, H, W) f32. Returns (N, C, H, W) f32."""
    n, c, h, w = x.shape
    hq, wq_sz = h // 4, w // 4
    L = hq * wq_sz
    c8 = c // 8
    c8p = _round_up(c8, 16)          # sublane-tile-aligned per-branch row count

    # Generation-aware targets.
    vmem_cap, is_v5, is_v7 = _tpu_info()
    bf16_probs = not is_v5
    if vmem_cap <= (96 << 20):       # v7x-class (64 MiB VMEM)
        tq_target, tm_target = 1024, 512
    else:                            # v5e / v6e (128 MiB VMEM)
        tq_target, tm_target = 2048, 512

    # Tile selection: pad L up toward the target tile (never degrade to 128-wide
    # tiles for awkward sizes); key tile divides the query padding.
    l128 = _round_up(L, 128)
    tile_m = min(tm_target, l128)                              # multiple of 128
    tile_q = min(tq_target, _round_up(l128, tile_m))           # multiple of tile_m
    l_pad = _round_up(L, tile_q)

    # Megacore occupancy on v7x (2 TensorCores): ensure >= 2 parallel work items.
    if is_v7 and n * (l_pad // tile_q) < 2 and l_pad >= 256:
        tile_q = _choose_tile(l_pad, l_pad // 2)

    n_l = l_pad // tile_q
    n_m = l_pad // tile_m

    # Downsample + flatten.
    xr = resize_bilinear_nchw(x, hq, wq_sz).reshape(n, c, L).astype(jnp.float32)
    trr = resize_bilinear_nchw(trimap, hq, wq_sz).reshape(n, 3, L).astype(jnp.float32)
    if l_pad != L:
        pad = l_pad - L
        xr = jnp.pad(xr, ((0, 0), (0, 0), (0, pad)))
        trr = jnp.pad(trr, ((0, 0), (0, 0), (0, pad)))
    # Key-view x stream pre-cast to bf16 (re-read n_l times -> dominant HBM traffic).
    x_key = xr.astype(jnp.bfloat16)

    # Stack the 3 branches; zero-pad C8 rows to c8p so per-branch slices are aligned.
    def _pad_rows(a, rows_to):
        padr = rows_to - a.shape[1]
        return jnp.pad(a, ((0, 0), (0, padr), (0, 0))) if padr else a

    wq_s = _pad_rows(params["wq"], c8p).reshape(3 * c8p, c).astype(jnp.bfloat16)  # (3*C8p, C)
    wk_s = _pad_rows(params["wk"], c8p).reshape(3 * c8p, c).astype(jnp.bfloat16)  # (3*C8p, C)
    wv_s = params["wv"].reshape(3 * c, c).astype(jnp.bfloat16)                    # (3*C, C)
    bq_s = _pad_rows(params["bq"], c8p).astype(jnp.float32)                       # (3, C8p, 1)
    bk_s = _pad_rows(params["bk"], c8p).astype(jnp.float32)                       # (3, C8p, 1)
    bv_s = params["bv"].astype(jnp.float32)                                       # (3, C, 1)
    gamma_s = params["gamma"].astype(jnp.float32).reshape(3, 1, 1)                # (3, 1, 1)

    kernel = _make_trimap_attn_kernel(c, c8p, L, l_pad, tile_m, bf16_probs)

    grid_spec = pltpu.PrefetchScalarGridSpec(
        num_scalar_prefetch=0,
        grid=(n, n_l, n_m),
        in_specs=[
            pl.BlockSpec((1, c, tile_q), lambda b, li, mi: (b, 0, li)),   # x  (query tile, f32)
            pl.BlockSpec((1, c, tile_m), lambda b, li, mi: (b, 0, mi)),   # x  (key tile, bf16)
            pl.BlockSpec((1, 3, tile_q), lambda b, li, mi: (b, 0, li)),   # trimap (query tile)
            pl.BlockSpec((1, 3, tile_m), lambda b, li, mi: (b, 0, mi)),   # trimap (key tile)
            pl.BlockSpec((3 * c8p, c), lambda b, li, mi: (0, 0)),         # wq (stacked, bf16)
            pl.BlockSpec((3, c8p, 1), lambda b, li, mi: (0, 0, 0)),       # bq
            pl.BlockSpec((3 * c8p, c), lambda b, li, mi: (0, 0)),         # wk (stacked, bf16)
            pl.BlockSpec((3, c8p, 1), lambda b, li, mi: (0, 0, 0)),       # bk
            pl.BlockSpec((3 * c, c), lambda b, li, mi: (0, 0)),           # wv
            pl.BlockSpec((3, c, 1), lambda b, li, mi: (0, 0, 0)),         # bv
            pl.BlockSpec((3, 1, 1), lambda b, li, mi: (0, 0, 0)),         # gamma (f32)
        ],
        out_specs=pl.BlockSpec((1, c, tile_q), lambda b, li, mi: (b, 0, li)),
        scratch_shapes=[pltpu.VMEM((3, c8p, tile_q), jnp.bfloat16)],      # Q tiles (persist over mi)
    )

    out = pl.pallas_call(
        kernel,
        out_shape=jax.ShapeDtypeStruct((n, c, l_pad), jnp.float32),
        grid_spec=grid_spec,
        compiler_params=pltpu.CompilerParams(
            dimension_semantics=("parallel", "parallel", "arbitrary"),
            vmem_limit_bytes=_vmem_limit_bytes(c, c8p, tile_q, tile_m, vmem_cap),
        ),
    )(xr, x_key, trr, trr, wq_s, bq_s, wk_s, bk_s, wv_s, bv_s, gamma_s)

    out = out[:, :, :L].reshape(n, c, hq, wq_sz)
    out = resize_bilinear_nchw(out, h, w)
    return out


# ---------------------------------------------------------------------------
# Pure-JAX reference (same math, f32 end-to-end) for a sanity check
# ---------------------------------------------------------------------------
def self_attn_trimap_reference(x, trimap, params):
    n, c, h, w = x.shape
    hq, wq_sz = h // 4, w // 4
    L = hq * wq_sz
    xr = resize_bilinear_nchw(x, hq, wq_sz).reshape(n, c, L)
    trr = resize_bilinear_nchw(trimap, hq, wq_sz).reshape(n, 3, L)
    out = xr
    for br in range(3):
        t = trr[:, br:br + 1, :]
        xm = xr * t
        q = jnp.einsum("oc,ncl->nol", params["wq"][br], xm) + params["bq"][br]
        k = jnp.einsum("oc,ncl->nol", params["wk"][br], xm) + params["bk"][br]
        v = jnp.einsum("oc,ncl->nol", params["wv"][br], xm) + params["bv"][br]
        energy = jnp.einsum("ncl,ncm->nlm", q, k)
        attn = jax.nn.sigmoid(energy)
        o = jnp.einsum("ncm,nlm->ncl", v, attn)
        out = out + params["gamma"][br] * o
    out = out.reshape(n, c, hq, wq_sz)
    return resize_bilinear_nchw(out, h, w)


# ---------------------------------------------------------------------------
# Deterministic parameter init (shapes from Self_Attn_trimap.__init__)
# Branch order matches trimap channels: 0 = bg, 1 = transition, 2 = fg.
# ---------------------------------------------------------------------------
def init_params(key, in_dim: int):
    c8 = in_dim // 8
    keys = jax.random.split(key, 6)
    scale = 1.0 / jnp.sqrt(jnp.float32(in_dim))
    params = {
        "wq": jax.random.normal(keys[0], (3, c8, in_dim), jnp.float32) * scale,
        "bq": jax.random.normal(keys[1], (3, c8, 1), jnp.float32) * 0.01,
        "wk": jax.random.normal(keys[2], (3, c8, in_dim), jnp.float32) * scale,
        "bk": jax.random.normal(keys[3], (3, c8, 1), jnp.float32) * 0.01,
        "wv": jax.random.normal(keys[4], (3, in_dim, in_dim), jnp.float32) * scale,
        "bv": jax.random.normal(keys[5], (3, in_dim, 1), jnp.float32) * 0.01,
        # NOTE: PyTorch initializes gamma=0 (attention path disabled at init); use small
        # nonzero values here so the attention kernel path is actually exercised.
        "gamma": jnp.array([0.1, 0.2, 0.3], jnp.float32),
    }
    return params


if __name__ == "__main__":
    key = jax.random.PRNGKey(0)
    k_x, k_t, k_p = jax.random.split(key, 3)

    N, C, H, W = 2, 32, 16, 16
    x = jax.random.normal(k_x, (N, C, H, W), jnp.float32)
    # trimap-like: 3 non-negative channels summing to 1 per pixel
    trimap = jax.nn.softmax(jax.random.normal(k_t, (N, 3, H, W), jnp.float32), axis=1)

    params = init_params(k_p, C)

    fwd = jax.jit(self_attn_trimap_forward)
    out = fwd(x, trimap, params)
    jax.block_until_ready(out)

    assert out.shape == (N, C, H, W), out.shape
    assert bool(jnp.all(jnp.isfinite(out)))

    # Sanity check against the f32 pure-JAX reference (kernel uses bf16 matmuls +
    # bf16 key stream / probabilities).
    ref = self_attn_trimap_reference(x, trimap, params)
    max_err = float(jnp.max(jnp.abs(out - ref)))
    assert max_err < 1e-1, f"max abs err vs reference: {max_err}"

    print("KERNEL_OK")
</pallas_src>

<mosaic_0001>
module attributes {stable_mosaic.version = 11 : i64} {
  func.func @kernel(%arg0: i32, %arg1: i32, %arg2: i32, %arg3: memref<1x32x128xf32, #tpu.memory_space<vmem>>, %arg4: memref<1x32x128xbf16, #tpu.memory_space<vmem>>, %arg5: memref<1x3x128xf32, #tpu.memory_space<vmem>>, %arg6: memref<1x3x128xf32, #tpu.memory_space<vmem>>, %arg7: memref<48x32xbf16, #tpu.memory_space<vmem>>, %arg8: memref<3x16x1xf32, #tpu.memory_space<vmem>>, %arg9: memref<48x32xbf16, #tpu.memory_space<vmem>>, %arg10: memref<3x16x1xf32, #tpu.memory_space<vmem>>, %arg11: memref<96x32xbf16, #tpu.memory_space<vmem>>, %arg12: memref<3x32x1xf32, #tpu.memory_space<vmem>>, %arg13: memref<3x1x1xf32, #tpu.memory_space<vmem>>, %arg14: memref<1x32x128xf32, #tpu.memory_space<vmem>>, %arg15: memref<3x16x128xbf16, #tpu.memory_space<vmem>>) attributes {dimension_semantics = [#tpu.dimension_semantics<parallel>, #tpu.dimension_semantics<parallel>, #tpu.dimension_semantics<arbitrary>], iteration_bounds = array<i64: 2, 1, 1>, scalar_prefetch = 0 : i64, scratch_operands = 1 : i64, tpu.core_type = #tpu.core_type<tc>, window_params = [{transform_indices = @transform_0, window_bounds = array<i64: 1, 32, 128>}, {transform_indices = @transform_1, window_bounds = array<i64: 1, 32, 128>}, {transform_indices = @transform_2, window_bounds = array<i64: 1, 3, 128>}, {transform_indices = @transform_3, window_bounds = array<i64: 1, 3, 128>}, {pipeline_mode = #tpu.pipeline_mode<synchronous>, transform_indices = @transform_4, window_bounds = array<i64: 48, 32>}, {pipeline_mode = #tpu.pipeline_mode<synchronous>, transform_indices = @transform_5, window_bounds = array<i64: 3, 16, 1>}, {pipeline_mode = #tpu.pipeline_mode<synchronous>, transform_indices = @transform_6, window_bounds = array<i64: 48, 32>}, {pipeline_mode = #tpu.pipeline_mode<synchronous>, transform_indices = @transform_7, window_bounds = array<i64: 3, 16, 1>}, {pipeline_mode = #tpu.pipeline_mode<synchronous>, transform_indices = @transform_8, window_bounds = array<i64: 96, 32>}, {pipeline_mode = #tpu.pipeline_mode<synchronous>, transform_indices = @transform_9, window_bounds = array<i64: 3, 32, 1>}, {pipeline_mode = #tpu.pipeline_mode<synchronous>, transform_indices = @transform_10, window_bounds = array<i64: 3, 1, 1>}, {transform_indices = @transform_11, window_bounds = array<i64: 1, 32, 128>}]} {
    %c0_i32 = arith.constant 0 : i32
    %0 = arith.cmpi eq, %arg2, %c0_i32 : i32
    %1 = arith.extui %0 : i1 to i32
    %c0_i32_0 = arith.constant 0 : i32
    %2 = arith.cmpi ne, %1, %c0_i32_0 : i32
    scf.if %2 {
      %c0_60 = arith.constant 0 : index
      %c0_61 = arith.constant 0 : index
      %c0_62 = arith.constant 0 : index
      %126 = vector.load %arg3[%c0_60, %c0_61, %c0_62] : memref<1x32x128xf32, #tpu.memory_space<vmem>>, vector<1x32x128xf32>
      %127 = vector.shape_cast %126 : vector<1x32x128xf32> to vector<32x128xf32>
      %c0_63 = arith.constant 0 : index
      %c0_64 = arith.constant 0 : index
      %c0_65 = arith.constant 0 : index
      %128 = vector.load %arg14[%c0_63, %c0_64, %c0_65] : memref<1x32x128xf32, #tpu.memory_space<vmem>>, vector<1x32x128xf32>
      %129 = vector.shape_cast %128 : vector<1x32x128xf32> to vector<32x128xf32>
      %130 = vector.shape_cast %127 : vector<32x128xf32> to vector<1x32x128xf32>
      tpu.vector_store %arg14[%c0_63, %c0_64, %c0_65], %130 {strides = array<i32>} : memref<1x32x128xf32, #tpu.memory_space<vmem>>, vector<1x32x128xf32>,
      %c0_66 = arith.constant 0 : index
      %c0_67 = arith.constant 0 : index
      %131 = vector.load %arg7[%c0_66, %c0_67] : memref<48x32xbf16, #tpu.memory_space<vmem>>, vector<48x32xbf16>
      %132 = arith.truncf %127 : vector<32x128xf32> to vector<32x128xbf16>
      %cst_68 = arith.constant dense<0.000000e+00> : vector<48x128xf32>
      %133 = tpu.matmul %131, %132, %cst_68 {dimension_numbers = #tpu.dot_dimension_numbers<[1], [0], [0], [1], [0, 0, 1, 1], [], []>} : vector<48x32xbf16>, vector<32x128xbf16>, vector<48x128xf32> -> vector<48x128xf32>
      %c0_69 = arith.constant 0 : index
      %c0_70 = arith.constant 0 : index
      %c0_71 = arith.constant 0 : index
      %134 = vector.load %arg5[%c0_69, %c0_70, %c0_71] : memref<1x3x128xf32, #tpu.memory_space<vmem>>, vector<1x3x128xf32>
      %135 = vector.shape_cast %134 : vector<1x3x128xf32> to vector<3x128xf32>
      %136 = vector.extract_strided_slice %135 {offsets = [0, 0], sizes = [1, 128], strides = [1, 1]} : vector<3x128xf32> to vector<1x128xf32>
      %137 = vector.extract_strided_slice %133 {offsets = [0, 0], sizes = [16, 128], strides = [1, 1]} : vector<48x128xf32> to vector<16x128xf32>
      %138 = vector.broadcast %136 : vector<1x128xf32> to vector<16x128xf32>
      %139 = arith.mulf %138, %137 : vector<16x128xf32>
      %c0_72 = arith.constant 0 : index
      %c0_73 = arith.constant 0 : index
      %c0_74 = arith.constant 0 : index
      %140 = vector.load %arg8[%c0_72, %c0_73, %c0_74] : memref<3x16x1xf32, #tpu.memory_space<vmem>>, vector<1x16x1xf32>
      %141 = vector.shape_cast %140 : vector<1x16x1xf32> to vector<16x1xf32>
      %142 = vector.broadcast %141 : vector<16x1xf32> to vector<16x128xf32>
      %143 = arith.addf %139, %142 : vector<16x128xf32>
      %144 = arith.truncf %143 : vector<16x128xf32> to vector<16x128xbf16>
      %c0_75 = arith.constant 0 : index
      %c0_76 = arith.constant 0 : index
      %c0_77 = arith.constant 0 : index
      %145 = vector.load %arg15[%c0_75, %c0_76, %c0_77] : memref<3x16x128xbf16, #tpu.memory_space<vmem>>, vector<1x16x128xbf16>
      %146 = vector.shape_cast %145 : vector<1x16x128xbf16> to vector<16x128xbf16>
      %147 = vector.shape_cast %144 : vector<16x128xbf16> to vector<1x16x128xbf16>
      tpu.vector_store %arg15[%c0_75, %c0_76, %c0_77], %147 {strides = array<i32>} : memref<3x16x128xbf16, #tpu.memory_space<vmem>>, vector<1x16x128xbf16>,
      %148 = vector.extract_strided_slice %135 {offsets = [1, 0], sizes = [1, 128], strides = [1, 1]} : vector<3x128xf32> to vector<1x128xf32>
      %149 = vector.extract_strided_slice %133 {offsets = [16, 0], sizes = [16, 128], strides = [1, 1]} : vector<48x128xf32> to vector<16x128xf32>
      %150 = vector.broadcast %148 : vector<1x128xf32> to vector<16x128xf32>
      %151 = arith.mulf %150, %149 : vector<16x128xf32>
      %c1_78 = arith.constant 1 : index
      %c0_79 = arith.constant 0 : index
      %c0_80 = arith.constant 0 : index
      %152 = vector.load %arg8[%c1_78, %c0_79, %c0_80] : memref<3x16x1xf32, #tpu.memory_space<vmem>>, vector<1x16x1xf32>
      %153 = vector.shape_cast %152 : vector<1x16x1xf32> to vector<16x1xf32>
      %154 = vector.broadcast %153 : vector<16x1xf32> to vector<16x128xf32>
      %155 = arith.addf %151, %154 : vector<16x128xf32>
      %156 = arith.truncf %155 : vector<16x128xf32> to vector<16x128xbf16>
      %c1_81 = arith.constant 1 : index
      %c0_82 = arith.constant 0 : index
      %c0_83 = arith.constant 0 : index
      %157 = vector.load %arg15[%c1_81, %c0_82, %c0_83] : memref<3x16x128xbf16, #tpu.memory_space<vmem>>, vector<1x16x128xbf16>
      %158 = vector.shape_cast %157 : vector<1x16x128xbf16> to vector<16x128xbf16>
      %159 = vector.shape_cast %156 : vector<16x128xbf16> to vector<1x16x128xbf16>
      tpu.vector_store %arg15[%c1_81, %c0_82, %c0_83], %159 {strides = array<i32>} : memref<3x16x128xbf16, #tpu.memory_space<vmem>>, vector<1x16x128xbf16>,
      %160 = vector.extract_strided_slice %135 {offsets = [2, 0], sizes = [1, 128], strides = [1, 1]} : vector<3x128xf32> to vector<1x128xf32>
      %161 = vector.extract_strided_slice %133 {offsets = [32, 0], sizes = [16, 128], strides = [1, 1]} : vector<48x128xf32> to vector<16x128xf32>
      %162 = vector.broadcast %160 : vector<1x128xf32> to vector<16x128xf32>
      %163 = arith.mulf %162, %161 : vector<16x128xf32>
      %c2_84 = arith.constant 2 : index
      %c0_85 = arith.constant 0 : index
      %c0_86 = arith.constant 0 : index
      %164 = vector.load %arg8[%c2_84, %c0_85, %c0_86] : memref<3x16x1xf32, #tpu.memory_space<vmem>>, vector<1x16x1xf32>
      %165 = vector.shape_cast %164 : vector<1x16x1xf32> to vector<16x1xf32>
      %166 = vector.broadcast %165 : vector<16x1xf32> to vector<16x128xf32>
      %167 = arith.addf %163, %166 : vector<16x128xf32>
      %168 = arith.truncf %167 : vector<16x128xf32> to vector<16x128xbf16>
      %c2_87 = arith.constant 2 : index
      %c0_88 = arith.constant 0 : index
      %c0_89 = arith.constant 0 : index
      %169 = vector.load %arg15[%c2_87, %c0_88, %c0_89] : memref<3x16x128xbf16, #tpu.memory_space<vmem>>, vector<1x16x128xbf16>
      %170 = vector.shape_cast %169 : vector<1x16x128xbf16> to vector<16x128xbf16>
      %171 = vector.shape_cast %168 : vector<16x128xbf16> to vector<1x16x128xbf16>
      tpu.vector_store %arg15[%c2_87, %c0_88, %c0_89], %171 {strides = array<i32>} : memref<3x16x128xbf16, #tpu.memory_space<vmem>>, vector<1x16x128xbf16>,
    } else {
    }
    %c0 = arith.constant 0 : index
    %c0_1 = arith.constant 0 : index
    %c0_2 = arith.constant 0 : index
    %3 = vector.load %arg4[%c0, %c0_1, %c0_2] : memref<1x32x128xbf16, #tpu.memory_space<vmem>>, vector<1x32x128xbf16>
    %4 = vector.shape_cast %3 : vector<1x32x128xbf16> to vector<32x128xbf16>
    %c0_3 = arith.constant 0 : index
    %c0_4 = arith.constant 0 : index
    %c0_5 = arith.constant 0 : index
    %5 = vector.load %arg6[%c0_3, %c0_4, %c0_5] : memref<1x3x128xf32, #tpu.memory_space<vmem>>, vector<1x3x128xf32>
    %6 = vector.shape_cast %5 : vector<1x3x128xf32> to vector<3x128xf32>
    %c0_6 = arith.constant 0 : index
    %c0_7 = arith.constant 0 : index
    %7 = vector.load %arg9[%c0_6, %c0_7] : memref<48x32xbf16, #tpu.memory_space<vmem>>, vector<48x32xbf16>
    %cst = arith.constant dense<0.000000e+00> : vector<48x128xf32>
    %8 = tpu.matmul %7, %4, %cst {dimension_numbers = #tpu.dot_dimension_numbers<[1], [0], [0], [1], [0, 0, 1, 1], [], []>} : vector<48x32xbf16>, vector<32x128xbf16>, vector<48x128xf32> -> vector<48x128xf32>
    %c0_8 = arith.constant 0 : index
    %c0_9 = arith.constant 0 : index
    %9 = vector.load %arg11[%c0_8, %c0_9] : memref<96x32xbf16, #tpu.memory_space<vmem>>, vector<96x32xbf16>
    %cst_10 = arith.constant dense<0.000000e+00> : vector<96x128xf32>
    %10 = tpu.matmul %9, %4, %cst_10 {dimension_numbers = #tpu.dot_dimension_numbers<[1], [0], [0], [1], [0, 0, 1, 1], [], []>} : vector<96x32xbf16>, vector<32x128xbf16>, vector<96x128xf32> -> vector<96x128xf32>
    %c128_i32 = arith.constant 128 : i32
    %11 = arith.muli %arg2, %c128_i32 : i32
    %12 = tpu.iota {dimensions = array<i32: 1>} : vector<1x128xi32>
    %13 = vector.broadcast %11 : i32 to vector<1x128xi32>
    %14 = arith.addi %13, %12 : vector<1x128xi32>
    %c16_i32 = arith.constant 16 : i32
    %15 = vector.broadcast %c16_i32 : i32 to vector<1x128xi32>
    %16 = arith.cmpi slt, %14, %15 : vector<1x128xi32>
    %17 = arith.extui %16 : vector<1x128xi1> to vector<1x128xi32>
    %18 = arith.sitofp %17 : vector<1x128xi32> to vector<1x128xf32>
    %19 = vector.extract_strided_slice %6 {offsets = [0, 0], sizes = [1, 128], strides = [1, 1]} : vector<3x128xf32> to vector<1x128xf32>
    %20 = vector.extract_strided_slice %8 {offsets = [0, 0], sizes = [16, 128], strides = [1, 1]} : vector<48x128xf32> to vector<16x128xf32>
    %21 = vector.broadcast %19 : vector<1x128xf32> to vector<16x128xf32>
    %22 = arith.mulf %21, %20 : vector<16x128xf32>
    %c0_11 = arith.constant 0 : index
    %c0_12 = arith.constant 0 : index
    %c0_13 = arith.constant 0 : index
    %23 = vector.load %arg10[%c0_11, %c0_12, %c0_13] : memref<3x16x1xf32, #tpu.memory_space<vmem>>, vector<1x16x1xf32>
    %24 = vector.shape_cast %23 : vector<1x16x1xf32> to vector<16x1xf32>
    %25 = vector.broadcast %24 : vector<16x1xf32> to vector<16x128xf32>
    %26 = arith.addf %22, %25 : vector<16x128xf32>
    %27 = vector.extract_strided_slice %10 {offsets = [0, 0], sizes = [32, 128], strides = [1, 1]} : vector<96x128xf32> to vector<32x128xf32>
    %28 = vector.broadcast %19 : vector<1x128xf32> to vector<32x128xf32>
    %29 = arith.mulf %28, %27 : vector<32x128xf32>
    %c0_14 = arith.constant 0 : index
    %c0_15 = arith.constant 0 : index
    %c0_16 = arith.constant 0 : index
    %30 = vector.load %arg12[%c0_14, %c0_15, %c0_16] : memref<3x32x1xf32, #tpu.memory_space<vmem>>, vector<1x32x1xf32>
    %31 = vector.shape_cast %30 : vector<1x32x1xf32> to vector<32x1xf32>
    %32 = vector.broadcast %31 : vector<32x1xf32> to vector<32x128xf32>
    %33 = arith.addf %29, %32 : vector<32x128xf32>
    %34 = vector.broadcast %18 : vector<1x128xf32> to vector<32x128xf32>
    %35 = arith.mulf %33, %34 : vector<32x128xf32>
    %36 = arith.truncf %26 : vector<16x128xf32> to vector<16x128xbf16>
    %c0_17 = arith.constant 0 : index
    %c0_18 = arith.constant 0 : index
    %c0_19 = arith.constant 0 : index
    %37 = vector.load %arg15[%c0_17, %c0_18, %c0_19] : memref<3x16x128xbf16, #tpu.memory_space<vmem>>, vector<1x16x128xbf16>
    %38 = vector.shape_cast %37 : vector<1x16x128xbf16> to vector<16x128xbf16>
    %cst_20 = arith.constant dense<0.000000e+00> : vector<128x128xf32>
    %39 = tpu.matmul %36, %38, %cst_20 {dimension_numbers = #tpu.dot_dimension_numbers<[0], [0], [1], [1], [0, 1, 1, 1], [], []>} : vector<16x128xbf16>, vector<16x128xbf16>, vector<128x128xf32> -> vector<128x128xf32>
    %40 = arith.truncf %39 : vector<128x128xf32> to vector<128x128xbf16>
    %41 = arith.negf %40 : vector<128x128xbf16>
    %42 = math.exp %41 : vector<128x128xbf16>
    %cst_21 = arith.constant 1.000000e+00 : bf16
    %43 = vector.broadcast %cst_21 : bf16 to vector<128x128xbf16>
    %44 = arith.addf %43, %42 : vector<128x128xbf16>
    %45 = arith.divf %43, %44 : vector<128x128xbf16>
    %46 = arith.truncf %35 : vector<32x128xf32> to vector<32x128xbf16>
    %cst_22 = arith.constant dense<0.000000e+00> : vector<32x128xf32>
    %47 = tpu.matmul %46, %45, %cst_22 {dimension_numbers = #tpu.dot_dimension_numbers<[1], [0], [0], [1], [0, 0, 1, 1], [], []>} : vector<32x128xbf16>, vector<128x128xbf16>, vector<32x128xf32> -> vector<32x128xf32>
    %c0_23 = arith.constant 0 : index
    %c0_24 = arith.constant 0 : index
    %c0_25 = arith.constant 0 : index
    %48 = vector.load %arg13[%c0_23, %c0_24, %c0_25] : memref<3x1x1xf32, #tpu.memory_space<vmem>>, vector<1x1x1xf32>
    %49 = vector.shape_cast %48 : vector<1x1x1xf32> to vector<1x1xf32>
    %50 = vector.broadcast %49 : vector<1x1xf32> to vector<32x128xf32>
    %51 = arith.mulf %50, %47 : vector<32x128xf32>
    %52 = vector.extract_strided_slice %6 {offsets = [1, 0], sizes = [1, 128], strides = [1, 1]} : vector<3x128xf32> to vector<1x128xf32>
    %53 = vector.extract_strided_slice %8 {offsets = [16, 0], sizes = [16, 128], strides = [1, 1]} : vector<48x128xf32> to vector<16x128xf32>
    %54 = vector.broadcast %52 : vector<1x128xf32> to vector<16x128xf32>
    %55 = arith.mulf %54, %53 : vector<16x128xf32>
    %c1 = arith.constant 1 : index
    %c0_26 = arith.constant 0 : index
    %c0_27 = arith.constant 0 : index
    %56 = vector.load %arg10[%c1, %c0_26, %c0_27] : memref<3x16x1xf32, #tpu.memory_space<vmem>>, vector<1x16x1xf32>
    %57 = vector.shape_cast %56 : vector<1x16x1xf32> to vector<16x1xf32>
    %58 = vector.broadcast %57 : vector<16x1xf32> to vector<16x128xf32>
    %59 = arith.addf %55, %58 : vector<16x128xf32>
    %60 = vector.extract_strided_slice %10 {offsets = [32, 0], sizes = [32, 128], strides = [1, 1]} : vector<96x128xf32> to vector<32x128xf32>
    %61 = vector.broadcast %52 : vector<1x128xf32> to vector<32x128xf32>
    %62 = arith.mulf %61, %60 : vector<32x128xf32>
    %c1_28 = arith.constant 1 : index
    %c0_29 = arith.constant 0 : index
    %c0_30 = arith.constant 0 : index
    %63 = vector.load %arg12[%c1_28, %c0_29, %c0_30] : memref<3x32x1xf32, #tpu.memory_space<vmem>>, vector<1x32x1xf32>
    %64 = vector.shape_cast %63 : vector<1x32x1xf32> to vector<32x1xf32>
    %65 = vector.broadcast %64 : vector<32x1xf32> to vector<32x128xf32>
    %66 = arith.addf %62, %65 : vector<32x128xf32>
    %67 = vector.broadcast %18 : vector<1x128xf32> to vector<32x128xf32>
    %68 = arith.mulf %66, %67 : vector<32x128xf32>
    %69 = arith.truncf %59 : vector<16x128xf32> to vector<16x128xbf16>
    %c1_31 = arith.constant 1 : index
    %c0_32 = arith.constant 0 : index
    %c0_33 = arith.constant 0 : index
    %70 = vector.load %arg15[%c1_31, %c0_32, %c0_33] : memref<3x16x128xbf16, #tpu.memory_space<vmem>>, vector<1x16x128xbf16>
    %71 = vector.shape_cast %70 : vector<1x16x128xbf16> to vector<16x128xbf16>
    %cst_34 = arith.constant dense<0.000000e+00> : vector<128x128xf32>
    %72 = tpu.matmul %69, %71, %cst_34 {dimension_numbers = #tpu.dot_dimension_numbers<[0], [0], [1], [1], [0, 1, 1, 1], [], []>} : vector<16x128xbf16>, vector<16x128xbf16>, vector<128x128xf32> -> vector<128x128xf32>
    %73 = arith.truncf %72 : vector<128x128xf32> to vector<128x128xbf16>
    %74 = arith.negf %73 : vector<128x128xbf16>
    %75 = math.exp %74 : vector<128x128xbf16>
    %cst_35 = arith.constant 1.000000e+00 : bf16
    %76 = vector.broadcast %cst_35 : bf16 to vector<128x128xbf16>
    %77 = arith.addf %76, %75 : vector<128x128xbf16>
    %78 = arith.divf %76, %77 : vector<128x128xbf16>
    %79 = arith.truncf %68 : vector<32x128xf32> to vector<32x128xbf16>
    %cst_36 = arith.constant dense<0.000000e+00> : vector<32x128xf32>
    %80 = tpu.matmul %79, %78, %cst_36 {dimension_numbers = #tpu.dot_dimension_numbers<[1], [0], [0], [1], [0, 0, 1, 1], [], []>} : vector<32x128xbf16>, vector<128x128xbf16>, vector<32x128xf32> -> vector<32x128xf32>
    %c1_37 = arith.constant 1 : index
    %c0_38 = arith.constant 0 : index
    %c0_39 = arith.constant 0 : index
    %81 = vector.load %arg13[%c1_37, %c0_38, %c0_39] : memref<3x1x1xf32, #tpu.memory_space<vmem>>, vector<1x1x1xf32>
    %82 = vector.shape_cast %81 : vector<1x1x1xf32> to vector<1x1xf32>
    %83 = vector.broadcast %82 : vector<1x1xf32> to vector<32x128xf32>
    %84 = arith.mulf %83, %80 : vector<32x128xf32>
    %85 = arith.addf %51, %84 : vector<32x128xf32>
    %86 = vector.extract_strided_slice %6 {offsets = [2, 0], sizes = [1, 128], strides = [1, 1]} : vector<3x128xf32> to vector<1x128xf32>
    %87 = vector.extract_strided_slice %8 {offsets = [32, 0], sizes = [16, 128], strides = [1, 1]} : vector<48x128xf32> to vector<16x128xf32>
    %88 = vector.broadcast %86 : vector<1x128xf32> to vector<16x128xf32>
    %89 = arith.mulf %88, %87 : vector<16x128xf32>
    %c2 = arith.constant 2 : index
    %c0_40 = arith.constant 0 : index
    %c0_41 = arith.constant 0 : index
    %90 = vector.load %arg10[%c2, %c0_40, %c0_41] : memref<3x16x1xf32, #tpu.memory_space<vmem>>, vector<1x16x1xf32>
    %91 = vector.shape_cast %90 : vector<1x16x1xf32> to vector<16x1xf32>
    %92 = vector.broadcast %91 : vector<16x1xf32> to vector<16x128xf32>
    %93 = arith.addf %89, %92 : vector<16x128xf32>
    %94 = vector.extract_strided_slice %10 {offsets = [64, 0], sizes = [32, 128], strides = [1, 1]} : vector<96x128xf32> to vector<32x128xf32>
    %95 = vector.broadcast %86 : vector<1x128xf32> to vector<32x128xf32>
    %96 = arith.mulf %95, %94 : vector<32x128xf32>
    %c2_42 = arith.constant 2 : index
    %c0_43 = arith.constant 0 : index
    %c0_44 = arith.constant 0 : index
    %97 = vector.load %arg12[%c2_42, %c0_43, %c0_44] : memref<3x32x1xf32, #tpu.memory_space<vmem>>, vector<1x32x1xf32>
    %98 = vector.shape_cast %97 : vector<1x32x1xf32> to vector<32x1xf32>
    %99 = vector.broadcast %98 : vector<32x1xf32> to vector<32x128xf32>
    %100 = arith.addf %96, %99 : vector<32x128xf32>
    %101 = vector.broadcast %18 : vector<1x128xf32> to vector<32x128xf32>
    %102 = arith.mulf %100, %101 : vector<32x128xf32>
    %103 = arith.truncf %93 : vector<16x128xf32> to vector<16x128xbf16>
    %c2_45 = arith.constant 2 : index
    %c0_46 = arith.constant 0 : index
    %c0_47 = arith.constant 0 : index
    %104 = vector.load %arg15[%c2_45, %c0_46, %c0_47] : memref<3x16x128xbf16, #tpu.memory_space<vmem>>, vector<1x16x128xbf16>
    %105 = vector.shape_cast %104 : vector<1x16x128xbf16> to vector<16x128xbf16>
    %cst_48 = arith.constant dense<0.000000e+00> : vector<128x128xf32>
    %106 = tpu.matmul %103, %105, %cst_48 {dimension_numbers = #tpu.dot_dimension_numbers<[0], [0], [1], [1], [0, 1, 1, 1], [], []>} : vector<16x128xbf16>, vector<16x128xbf16>, vector<128x128xf32> -> vector<128x128xf32>
    %107 = arith.truncf %106 : vector<128x128xf32> to vector<128x128xbf16>
    %108 = arith.negf %107 : vector<128x128xbf16>
    %109 = math.exp %108 : vector<128x128xbf16>
    %cst_49 = arith.constant 1.000000e+00 : bf16
    %110 = vector.broadcast %cst_49 : bf16 to vector<128x128xbf16>
    %111 = arith.addf %110, %109 : vector<128x128xbf16>
    %112 = arith.divf %110, %111 : vector<128x128xbf16>
    %113 = arith.truncf %102 : vector<32x128xf32> to vector<32x128xbf16>
    %cst_50 = arith.constant dense<0.000000e+00> : vector<32x128xf32>
    %114 = tpu.matmul %113, %112, %cst_50 {dimension_numbers = #tpu.dot_dimension_numbers<[1], [0], [0], [1], [0, 0, 1, 1], [], []>} : vector<32x128xbf16>, vector<128x128xbf16>, vector<32x128xf32> -> vector<32x128xf32>
    %c2_51 = arith.constant 2 : index
    %c0_52 = arith.constant 0 : index
    %c0_53 = arith.constant 0 : index
    %115 = vector.load %arg13[%c2_51, %c0_52, %c0_53] : memref<3x1x1xf32, #tpu.memory_space<vmem>>, vector<1x1x1xf32>
    %116 = vector.shape_cast %115 : vector<1x1x1xf32> to vector<1x1xf32>
    %117 = vector.broadcast %116 : vector<1x1xf32> to vector<32x128xf32>
    %118 = arith.mulf %117, %114 : vector<32x128xf32>
    %119 = arith.addf %85, %118 : vector<32x128xf32>
    %c0_54 = arith.constant 0 : index
    %c0_55 = arith.constant 0 : index
    %c0_56 = arith.constant 0 : index
    %120 = vector.load %arg14[%c0_54, %c0_55, %c0_56] : memref<1x32x128xf32, #tpu.memory_space<vmem>>, vector<1x32x128xf32>
    %121 = vector.shape_cast %120 : vector<1x32x128xf32> to vector<32x128xf32>
    %122 = arith.addf %121, %119 : vector<32x128xf32>
    %c0_57 = arith.constant 0 : index
    %c0_58 = arith.constant 0 : index
    %c0_59 = arith.constant 0 : index
    %123 = vector.load %arg14[%c0_57, %c0_58, %c0_59] : memref<1x32x128xf32, #tpu.memory_space<vmem>>, vector<1x32x128xf32>
    %124 = vector.shape_cast %123 : vector<1x32x128xf32> to vector<32x128xf32>
    %125 = vector.shape_cast %122 : vector<32x128xf32> to vector<1x32x128xf32>
    tpu.vector_store %arg14[%c0_57, %c0_58, %c0_59], %125 {strides = array<i32>} : memref<1x32x128xf32, #tpu.memory_space<vmem>>, vector<1x32x128xf32>,
    return
  }
  func.func @transform_0(%arg0: i32, %arg1: i32, %arg2: i32) -> (i32, i32, i32) {
    %c0_i32 = arith.constant 0 : i32
    %c0_i32_0 = arith.constant 0 : i32
    return %arg0, %c0_i32, %arg1 : i32, i32, i32
  }
  func.func @transform_1(%arg0: i32, %arg1: i32, %arg2: i32) -> (i32, i32, i32) {
    %c0_i32 = arith.constant 0 : i32
    %c0_i32_0 = arith.constant 0 : i32
    return %arg0, %c0_i32, %arg2 : i32, i32, i32
  }
  func.func @transform_2(%arg0: i32, %arg1: i32, %arg2: i32) -> (i32, i32, i32) {
    %c0_i32 = arith.constant 0 : i32
    %c0_i32_0 = arith.constant 0 : i32
    return %arg0, %c0_i32, %arg1 : i32, i32, i32
  }
  func.func @transform_3(%arg0: i32, %arg1: i32, %arg2: i32) -> (i32, i32, i32) {
    %c0_i32 = arith.constant 0 : i32
    %c0_i32_0 = arith.constant 0 : i32
    return %arg0, %c0_i32, %arg2 : i32, i32, i32
  }
  func.func @transform_4(%arg0: i32, %arg1: i32, %arg2: i32) -> (i32, i32) {
    %c0_i32 = arith.constant 0 : i32
    %c0_i32_0 = arith.constant 0 : i32
    %c0_i32_1 = arith.constant 0 : i32
    return %c0_i32, %c0_i32_0 : i32, i32
  }
  func.func @transform_5(%arg0: i32, %arg1: i32, %arg2: i32) -> (i32, i32, i32) {
    %c0_i32 = arith.constant 0 : i32
    %c0_i32_0 = arith.constant 0 : i32
    %c0_i32_1 = arith.constant 0 : i32
    %c0_i32_2 = arith.constant 0 : i32
    return %c0_i32, %c0_i32_0, %c0_i32_1 : i32, i32, i32
  }
  func.func @transform_6(%arg0: i32, %arg1: i32, %arg2: i32) -> (i32, i32) {
    %c0_i32 = arith.constant 0 : i32
    %c0_i32_0 = arith.constant 0 : i32
    %c0_i32_1 = arith.constant 0 : i32
    return %c0_i32, %c0_i32_0 : i32, i32
  }
  func.func @transform_7(%arg0: i32, %arg1: i32, %arg2: i32) -> (i32, i32, i32) {
    %c0_i32 = arith.constant 0 : i32
    %c0_i32_0 = arith.constant 0 : i32
    %c0_i32_1 = arith.constant 0 : i32
    %c0_i32_2 = arith.constant 0 : i32
    return %c0_i32, %c0_i32_0, %c0_i32_1 : i32, i32, i32
  }
  func.func @transform_8(%arg0: i32, %arg1: i32, %arg2: i32) -> (i32, i32) {
    %c0_i32 = arith.constant 0 : i32
    %c0_i32_0 = arith.constant 0 : i32
    %c0_i32_1 = arith.constant 0 : i32
    return %c0_i32, %c0_i32_0 : i32, i32
  }
  func.func @transform_9(%arg0: i32, %arg1: i32, %arg2: i32) -> (i32, i32, i32) {
    %c0_i32 = arith.constant 0 : i32
    %c0_i32_0 = arith.constant 0 : i32
    %c0_i32_1 = arith.constant 0 : i32
    %c0_i32_2 = arith.constant 0 : i32
    return %c0_i32, %c0_i32_0, %c0_i32_1 : i32, i32, i32
  }
  func.func @transform_10(%arg0: i32, %arg1: i32, %arg2: i32) -> (i32, i32, i32) {
    %c0_i32 = arith.constant 0 : i32
    %c0_i32_0 = arith.constant 0 : i32
    %c0_i32_1 = arith.constant 0 : i32
    %c0_i32_2 = arith.constant 0 : i32
    return %c0_i32, %c0_i32_0, %c0_i32_1 : i32, i32, i32
  }
  func.func @transform_11(%arg0: i32, %arg1: i32, %arg2: i32) -> (i32, i32, i32) {
    %c0_i32 = arith.constant 0 : i32
    %c0_i32_0 = arith.constant 0 : i32
    return %arg0, %c0_i32, %arg1 : i32, i32, i32
  }
}

</mosaic_0001>

<bundles_post_ra>
// kernel: self_attn_trimap_forward.1
= control target key start
LH: loop header
LB: loop body
LE: loop exit
PB: predicated region body
PF: predicated region fallthrough
CT: control target
= control target key end

     0   :  { %s2653_s17 = smov 0   ;;  %s2655_s18 = smov 0   ;;  %s3006_s0 = inlined_call_operand.vmem [shape: f32[2,32,128], index: 0, kind: input, shape index: {}]   ;;  %s3007_s1 = inlined_call_operand.vmem [shape: bf16[2,32,128], index: 1, kind: input, shape index: {}]   ;;  %s3008_s2 = inlined_call_operand.vmem [shape: f32[2,3,128], index: 2, kind: input, shape index: {}, may-alias: {2,3}]   ;;  %s3009_s3 = inlined_call_operand.vmem [shape: f32[2,3,128], index: 3, kind: input, shape index: {}, may-alias: {2,3}]   ;;  %s3010_s4 = inlined_call_operand.vmem [shape: bf16[48,32], index: 4, kind: input, shape index: {}]   ;;  %s3011_s5 = inlined_call_operand.vmem [shape: f32[3,16,1], index: 5, kind: input, shape index: {}]   ;;  %s3012_s6 = inlined_call_operand.vmem [shape: bf16[48,32], index: 6, kind: input, shape index: {}]   ;;  %s3013_s7 = inlined_call_operand.vmem [shape: f32[3,16,1], index: 7, kind: input, shape index: {}]   ;;  %s3014_s8 = inlined_call_operand.vmem [shape: bf16[96,32], index: 8, kind: input, shape index: {}]   ;;  %s3015_s9 = inlined_call_operand.vmem [shape: f32[3,32,1], index: 9, kind: input, shape index: {}]   ;;  %s3016_s10 = inlined_call_operand.vmem [shape: f32[3,1,1], index: 10, kind: input, shape index: {}]   ;;  %s3017_s11 = inlined_call_operand.vmem [shape: f32[2,32,128], index: 11, kind: output, shape index: {}]  }
   0x1   :  { %s2657_s19 = smov 0  }
   0x2 LB: > { %s40_s20 = sadd.s32 1, %s2584_s18  ;;  %p2080_p0 = scmp.ge.s32.totalorder %s2588_s19, 1  ;;  %s2588_s19 = sphi %s2657_s19, %s21_s19   ;;  %s2584_s18 = sphi %s2655_s18, %s3019_s18   ;;  %s2580_s17 = sphi %s2653_s17, %s3018_s17  }
   0x3   : > { %p42_p1 = scmp.ge.s32.totalorder %s40_s20, 2  ;;  %p406_p2 = scmp.lt.s32.totalorder %s2588_s19, 3 }
   0x5   : > { %s3021_s20 = smov (%p42_p1, %s40_s20), 0  ;;  %p407_p3 = pnand %p2080_p0, %p406_p2 }
   0x6   : > { %p474_p4 = scmp.lt.s32.totalorder (!%p407_p3), %s2580_s17, 1  ;;  %v2590_v0 = vmov (!%p407_p3), 0.0   ;;  %vm2591_vm0 = vmmov (!%p407_p3), 0   ;;  %v2592_v6 = vmov (!%p407_p3), 0   ;;  %v947_v10 = vld [vmem:[%s3013_s7] sm:$0xff] (!%p407_p3)  ;;  %v2137_v11 = vld [vmem:[%s3013_s7 + $0x10] sm:$0xff] (!%p407_p3)  ;;  %v617_v34 = vlaneseq (!%p407_p3) }
   0x7   : > { %410 = sbr.rel (%p407_p3) target bundleno = 918 (0x396), region = 64  ;;  %2265 = vmatprep.subr.bf16.mxu0 (!%p407_p3), %v2590_v0  ;;  %2281 = vmatprep.subr.bf16.mxu1 (!%p407_p3), %v2590_v0  ;;  %v2458_v12 = vld [vmem:[%s3010_s4] sm:$0xff] (!%p407_p3)   ;;  %v948_v14 = vld [vmem:[%s3013_s7 + $0x8] sm:$0xff] (!%p407_p3)  ;;  %v2138_v15 = vld [vmem:[%s3013_s7 + $0x18] sm:$0xff] (!%p407_p3)  ;;  %vm549_vm1 = vcmask (!%p407_p3), 261120   ;;  %vm1015_vm2 = vcmask (!%p407_p3), 130048  }
   0x8   : > { %2269 = vmatprep.mubr.msk.bf16.mxu0 (!%p407_p3), %vm2591_vm0, %v2590_v0  ;;  %2285 = vmatprep.mubr.msk.bf16.mxu1 (!%p407_p3), %vm2591_vm0, %v2590_v0  ;;  %v2459_v13 = vld [vmem:[%s3012_s6] sm:$0xff] (!%p407_p3)   ;;  %v624_v17 = vld [vmem:[%s3011_s5 + $0x8] sm:$0xff] (!%p407_p3)  ;;  %v2095_v22 = vld [vmem:[%s3011_s5 + $0x10] sm:$0xff] (!%p407_p3)  ;;  %v618_v35 = vshrl.u32 (!%p407_p3), %v617_v34, 7 }
   0x9   : > { %2454 = vset.pattern.permute.xlu0 (!%p407_p3), %v2592_v6  ;;  %2455 = vset.pattern.permute.xlu1 (!%p407_p3), %v2592_v6  ;;  %v623_v16 = vld [vmem:[%s3011_s5] sm:$0xff] (!%p407_p3)  ;;  %v2460_v18 = vld [vmem:[%s3010_s4 + $0x8] sm:$0xff] (!%p407_p3)   ;;  %v2096_v23 = vld [vmem:[%s3011_s5 + $0x18] sm:$0xff] (!%p407_p3) }
   0xa   : > { %951 = vperm.xlu0 (!%p407_p3), %2454, %v947_v10   ;;  %1277 = vperm.xlu1 (!%p407_p3), %2455, %v2137_v11   ;;  %v2461_v19 = vld [vmem:[%s3012_s6 + $0x8] sm:$0xff] (!%p407_p3)   ;;  %v2161_v20 = vld [vmem:[%s3013_s7 + $0x20] sm:$0xff] (!%p407_p3)  ;;  %v2462_v24 = vld [vmem:[%s3012_s6 + $0x10] sm:$0xff] (!%p407_p3)   ;;  %v665_v36 = vsub.s32 (!%p407_p3), 2, %v618_v35  ;;  %v619_v44 = vsub.s32 (!%p407_p3), 0, %v618_v35  ;;  %v641_v53 = vsub.s32 (!%p407_p3), 1, %v618_v35 }
   0xb   : > { %v2162_v21 = vld [vmem:[%s3013_s7 + $0x28] sm:$0xff] (!%p407_p3)  ;;  %v2463_v25 = vld [vmem:[%s3010_s4 + $0x10] sm:$0xff] (!%p407_p3)   ;;  %v2097_v26 = vld [vmem:[%s3011_s5 + $0x20] sm:$0xff] (!%p407_p3) }
   0xc   : > { %v2464_v27 = vld [vmem:[%s3014_s8] sm:$0xff] (!%p407_p3)   ;;  %v2098_v28 = vld [vmem:[%s3011_s5 + $0x28] sm:$0xff] (!%p407_p3)  ;;  %v2466_v30 = vld [vmem:[%s3014_s8 + $0x10] sm:$0xff] (!%p407_p3)  }
   0xd   : > { %v2465_v29 = vld [vmem:[%s3014_s8 + $0x8] sm:$0xff] (!%p407_p3)   ;;  %v2467_v31 = vld [vmem:[%s3014_s8 + $0x18] sm:$0xff] (!%p407_p3)   ;;  %v2468_v32 = vld [vmem:[%s3014_s8 + $0x20] sm:$0xff] (!%p407_p3)  }
   0xe   : > { %s3023_s17 = smov (!%p474_p4, %s2580_s17), 1  ;;  %956 = vperm.xlu0 %2454, %v948_v14   ;;  %1282 = vperm.xlu1 %2455, %v2138_v15   ;;  %v2469_v33 = vld [vmem:[%s3014_s8 + $0x28] sm:$0xff]  }
   0xf   : > { %s2187_s21 = sshll.u32 %s3023_s17, 5  ;;  %s2188_s22 = sshll.u32 %s3023_s17, 4 }
  0x10   : > { %s481_s25 = scalar_lea.vmem %s3006_s0, %s2187_s21  ;;  %s2687_s28 = scalar_lea.vmem %s3017_s11, %s2187_s21 }
  0x11   : > { %v518_v1 = vld [vmem:[%s481_s25] sm:$0xff]  ;;  %v519_v2 = vld [vmem:[%s481_s25 + $0x8] sm:$0xff]  ;;  %s489_s12 = scalar_lea.vmem %s3007_s1, %s2188_s22  ;;  %v520_v3 = vld [vmem:[%s481_s25 + $0x10] sm:$0xff]  ;;  %s2085_s23 = sshll.u32 %s3023_s17, 2 }
  0x12   : > { %522 = vst [vmem:[%s2687_s28] sm:$0xff] %v518_v1  ;;  %523 = vst [vmem:[%s2687_s28 + $0x8] sm:$0xff] %v519_v2  ;;  %v532_v4 = vpack.c.bf16 %v519_v2, %v518_v1  ;;  %v2456_v5 = vld [vmem:[%s489_s12] sm:$0xff]   ;;  %v521_v7 = vld [vmem:[%s481_s25 + $0x18] sm:$0xff]  ;;  %627 = vperm.xlu0 %2454, %v623_v16   ;;  %632 = vperm.xlu1 %2455, %v624_v17   ;;  %s496_s26 = scalar_lea.vmem %s3008_s2, %s2085_s23  ;;  %s503_s30 = scalar_lea.vmem %s3009_s3, %s2085_s23 }
  0x13   : > { %524 = vst [vmem:[%s2687_s28 + $0x10] sm:$0xff] %v520_v3  ;;  %2282 = vmatpush3.bf16.msra.mxu1 %v2456_v5  ;;  %525 = vst [vmem:[%s2687_s28 + $0x18] sm:$0xff] %v521_v7  ;;  %v533_v8 = vpack.c.bf16 %v521_v7, %v520_v3  ;;  %v2457_v9 = vld [vmem:[%s489_s12 + $0x8] sm:$0xff]   ;;  %v616_v37 = vld [vmem:[%s496_s26] sm:$0x7] }
  0x14   : > { %2266 = vmatpush3.bf16.msra.mxu0 %v532_v4  ;;  %2283 = vmatprep.subr.bf16.mxu1 %v2590_v0  ;;  %v2795_v38 = vrot.slane %v616_v37, %v665_v36  ;;  %v691_v46 = vld [vmem:[%s503_s30] sm:$0x7]  ;;  %v620_v47 = vrot.slane %v616_v37, %v619_v44  ;;  %v642_v1 = vrot.slane %v616_v37, %v641_v53 }
  0x15   : > { %2267 = vmatprep.subr.bf16.mxu0 %v2590_v0  ;;  %v2802_v48 = vrot.slane %v691_v46, %v619_v44  ;;  %v2806_v2 = vrot.slane %v691_v46, %v641_v53 }
  0x16   : > { %1609 = vperm.xlu0 %2454, %v2161_v20   ;;  %1614 = vperm.xlu1 %2455, %v2162_v21  }
  0x17   : > { %2284 = vmatpush3.bf16.msra.mxu1 %v2457_v9 }
  0x18   : > { %2268 = vmatpush3.bf16.msra.mxu0 %v533_v8 }
  0x19   : > { %2297 = vmatprep.subr.bf16.mxu0 %v2456_v5 }
  0x1a   : > { %2286 = vmatmul.mubr.msk.bf16.vlgmr.msra.gmra.mrb[0].mxu1 %vm549_vm1, %v2459_v13  ;;  %650 = vperm.xlu0 %2454, %v2095_v22  }
  0x1b   : > { %2270 = vmatmul.mubr.msk.bf16.vlgmr.msra.gmra.mrb[0].mxu0 %vm549_vm1, %v2458_v12  ;;  %2289 = vmatprep.mubr.msk.bf16.mxu1 %vm2591_vm0, %v2590_v0 }
  0x1c   : > { %2273 = vmatprep.mubr.msk.bf16.mxu0 %vm2591_vm0, %v2590_v0  ;;  %2298 = vmatpush3.bf16.msra.mxu0 %v2456_v5 }
  0x1d   : > { %2299 = vmatprep.subr.bf16.mxu0 %v2457_v9  ;;  %655 = vperm.xlu1 %2455, %v2096_v23  }
  0x20   : > { %2300 = vmatpush3.bf16.msra.mxu0 %v2457_v9 }
  0x21   : > { %674 = vperm.xlu1 %2455, %v2097_v26  }
  0x22   : > { %2290 = vmatmul.mubr.msk.bf16.gmra.mrb[4].mxu1 %vm549_vm1, %v2461_v19 }
  0x23   : > { %2274 = vmatmul.mubr.msk.bf16.gmra.mrb[4].mxu0 %vm549_vm1, %v2460_v18  ;;  %2293 = vmatprep.mubr.msk.bf16.mxu1 %vm2591_vm0, %v2590_v0 }
  0x24   : > { %2277 = vmatprep.mubr.msk.bf16.mxu0 %vm2591_vm0, %v2590_v0 }
  0x25   : > { %679 = vperm.xlu1 %2455, %v2098_v28  }
  0x2a   : > { %2294 = vmatmul.mubr.msk.bf16.gmra.mrb[8].mxu1 %vm549_vm1, %v2462_v24 }
  0x2b   : > { %2278 = vmatmul.mubr.msk.bf16.gmra.mrb[8].mxu0 %vm549_vm1, %v2463_v25  ;;  %v2810_v25 = vrot.slane %v691_v46, %v665_v36 }
  0x2c   : > { %2301 = vmatprep.mubr.msk.bf16.mxu0 %vm549_vm1, %v2464_v27 }
  0x33   : > { %2302 = vmatmul.mubr.msk.bf16.vlgmr.msra.gmra.mrb[12].mxu0 %vm549_vm1, %v2465_v29 }
  0x34   : > { %2305 = vmatprep.mubr.msk.bf16.mxu0 %vm549_vm1, %v2466_v30 }
  0x3b   : > { %2306 = vmatmul.mubr.msk.bf16.gmra.mrb[16].mxu0 %vm549_vm1, %v2467_v31 }
  0x3c   : > { %2309 = vmatprep.mubr.msk.bf16.mxu0 %vm549_vm1, %v2468_v32 }
  0x43   : > { %2310 = vmatmul.mubr.msk.bf16.gmra.mrb[20].mxu0 %vm549_vm1, %v2469_v33 }
  0x89   : > { %v1278_v39 = vpop.permute.xlu1 %1277  ;;  %v952_v41 = vpop.permute.xlu0 %951 }
  0x8d   : > { %v1283_v40 = vpop.permute.xlu1 %1282  ;;  %v957_v43 = vpop.permute.xlu0 %956 }
  0x91   : > { %v633_v42 = vpop.permute.xlu1 %632  ;;  %v628_v49 = vpop.permute.xlu0 %627 }
  0x95   : > { %v2800_v45 = vpop.permute.xlu1 %1614  ;;  %v1610_v7 = vpop.permute.xlu0 %1609 }
  0x99   : > { %v651_v24 = vpop.permute.xlu0 %650 }
  0x9c   : > { %v656_v50 = vpop.permute.xlu1 %655 }
  0xa0   : > { %v675_v10 = vpop.permute.xlu1 %674 }
  0xa4   : > { %v680_v31 = vpop.permute.xlu1 %679 }
  0xed   : > { %v769_v52 = vpop.f32.mrb[0].mxu1 }
  0xee   : > { %v593_v51 = vpop.f32.mrb[0].mxu0  ;;  %v945_v55 = vmul.f32 %v2802_v48, %v769_v52  ;;  %v2287_v57 = vpop.f32.mrb[1].mxu1 }
  0xef   : > { %v621_v54 = vmul.f32 %v620_v47, %v593_v51  ;;  %v2271_v56 = vpop.f32.mrb[1].mxu0  ;;  %v772_v59 = vpop.f32.mrb[2].mxu1  ;;  %v965_v57 = vld [vmem:[%s3015_s9] sm:$0xff] }
  0xf0   : > { %v596_v58 = vpop.f32.mrb[2].mxu0  ;;  %v946_v61 = vmul.f32 %v2802_v48, %v772_v59  ;;  %v2288_v62 = vpop.f32.mrb[3].mxu1  ;;  %v959_v4 = vadd.f32 %v952_v41, %v945_v55 }
  0xf1   : > { %v622_v60 = vmul.f32 %v620_v47, %v596_v58  ;;  %v2272_v63 = vpop.f32.mrb[3].mxu0  ;;  %v635_v3 = vadd.f32 %v628_v49, %v621_v54  ;;  %v968_v58 = vld [vmem:[%s3015_s9 + $0x18] sm:$0xff]  ;;  %v2139_v62 = vld [vmem:[%s3015_s9 + $0x20] sm:$0xff] }
  0xf2   : > { %v960_v5 = vadd.f32 %v957_v43, %v946_v61 }
  0xf3   : > { %v636_v6 = vadd.f32 %v633_v42, %v622_v60 }
  0xf4   : > { %v997_v9 = vpack.c.bf16 %v960_v5, %v959_v4 }
  0xf5   : > { %v637_v8 = vpack.c.bf16 %v636_v6, %v635_v3  ;;  %v777_v12 = vpop.f32.mrb[4].mxu1  ;;  %v2140_v6 = vld [vmem:[%s3015_s9 + $0x28] sm:$0xff] }
  0xf6   : > { %v601_v11 = vpop.f32.mrb[4].mxu0  ;;  %v1270_v14 = vmul.f32 %v2806_v2, %v777_v12  ;;  %999 = vxpose.xlu0.c.b16.start.end [1/1] (short) %v997_v9, 128  ;;  %v2291_v16 = vpop.f32.mrb[5].mxu1 }
  0xf7   : > { %v643_v13 = vmul.f32 %v642_v1, %v601_v11  ;;  %v2275_v15 = vpop.f32.mrb[5].mxu0  ;;  %2313 = vmatprep.subr.bf16.mxu1 %v637_v8  ;;  %v780_v18 = vpop.f32.mrb[6].mxu1  ;;  %v2142_v11 = vld [vmem:[%s3015_s9 + $0x38] sm:$0xff] }
  0xf8   : > { %v604_v17 = vpop.f32.mrb[6].mxu0  ;;  %2314 = vmatpush3.bf16.msra.mxu1 %v637_v8  ;;  %v1285_v19 = vadd.f32 %v1278_v39, %v1270_v14  ;;  %v1271_v21 = vmul.f32 %v2806_v2, %v780_v18  ;;  %v2292_v22 = vpop.f32.mrb[7].mxu1  ;;  %v2164_v15 = vld [vmem:[%s3015_s9 + $0x48] sm:$0xff]  ;;  %v2163_v18 = vld [vmem:[%s3015_s9 + $0x40] sm:$0xff] }
  0xf9   : > { %v644_v20 = vmul.f32 %v642_v1, %v604_v17  ;;  %v2276_v23 = vpop.f32.mrb[7].mxu0  ;;  %v658_v26 = vadd.f32 %v651_v24, %v643_v13  ;;  %v966_v13 = vld [vmem:[%s3015_s9 + $0x8] sm:$0xff]  ;;  %v2166_v22 = vld [vmem:[%s3015_s9 + $0x58] sm:$0xff]  ;;  %v2160_v24 = vld [vmem:[%s3016_s10 + $0x1] ss:$0 sm:$0xff] }
  0xfa   : > { %v1286_v27 = vadd.f32 %v1283_v40, %v1271_v21  ;;  %v2165_v23 = vld [vmem:[%s3015_s9 + $0x50] sm:$0xff] }
  0xfb   : > { %v659_v28 = vadd.f32 %v656_v50, %v644_v20 }
  0xfc   : > { %v1324_v30 = vpack.c.bf16 %v1286_v27, %v1285_v19 }
  0xfd   : > { %v2812_v29 = vpack.c.bf16 %v659_v28, %v658_v26  ;;  %v785_v32 = vpop.f32.mrb[8].mxu1  ;;  %v2184_v26 = vld [vmem:[%s3016_s10 + $0x2] ss:$0 sm:$0xff] }
  0xfe   : > { %v609_v33 = vpop.f32.mrb[8].mxu0  ;;  %v1602_v35 = vmul.f32 %v2810_v25, %v785_v32  ;;  %1327 = vxpose.xlu1.c.b16.start.end [1/1] (short) %v1324_v30, 128  ;;  %v2295_v37 = vpop.f32.mrb[9].mxu1 }
  0xff   : > { %2351 = vmatprep.subr.bf16.mxu1 %v2812_v29  ;;  %v667_v39 = vmul.f32 %v2795_v38, %v609_v33  ;;  %v2279_v41 = vpop.f32.mrb[9].mxu0  ;;  %v788_v36 = vpop.f32.mrb[10].mxu1 }
 0x100   : > { %v612_v42 = vpop.f32.mrb[10].mxu0  ;;  %v1603_v40 = vmul.f32 %v2810_v25, %v788_v36  ;;  %v2296_v46 = vpop.f32.mrb[11].mxu1  ;;  %v1617_v49 = vadd.f32 %v1610_v7, %v1602_v35 }
 0x101   : > { %v682_v43 = vadd.f32 %v675_v10, %v667_v39  ;;  %v668_v44 = vmul.f32 %v2795_v38, %v612_v42  ;;  %v2280_v47 = vpop.f32.mrb[11].mxu0 }
 0x102   : > { %v1618_v50 = vadd.f32 %v2800_v45, %v1603_v40  ;;  %v967_v45 = vld [vmem:[%s3015_s9 + $0x10] sm:$0xff] }
 0x103   : > { %v683_v51 = vadd.f32 %v680_v31, %v668_v44 }
 0x104   : > { %v1656_v53 = vpack.c.bf16 %v1618_v50, %v1617_v49  ;;  %v935_v49 = vand.u32 127, %v617_v34 }
 0x105   : > { %v2820_v52 = vpack.c.bf16 %v683_v51, %v682_v43 }
 0x106   : > { %v2303_v54 = vpop.f32.mrb[12].mxu0  ;;  %vm938_vm3 = vcmp.lt.s32.totalorder %v935_v49, 16 }
 0x107   : > { %v2823_v55 = vmul.f32 %v2303_v54, %v2802_v48  ;;  %v886_v56 = vpop.f32.mrb[13].mxu0 }
 0x108   : > { %v2829_v38 = vmul.f32 %v2802_v48, %v886_v56  ;;  %v2304_v59 = vpop.f32.mrb[14].mxu0 }
 0x109   : > { %v2838_v60 = vmul.f32 %v2304_v59, %v2802_v48  ;;  %v889_v61 = vpop.f32.mrb[15].mxu0 }
 0x10a   : > { %v2847_v4 = vmul.f32 %v2802_v48, %v889_v61  ;;  %v2141_v48 = vld [vmem:[%s3015_s9 + $0x30] sm:$0xff] }
 0x10e   : > { %v2307_v63 = vpop.f32.mrb[16].mxu0 }
 0x10f   : > { %v902_v1 = vpop.f32.mrb[17].mxu0  ;;  %v2850_v5 = vmul.f32 %v2307_v63, %v2806_v2 }
 0x110   : > { %v2844_v3 = vmul.f32 %v2806_v2, %v902_v1  ;;  %v2308_v7 = vpop.f32.mrb[18].mxu0 }
 0x111   : > { %v2856_v8 = vmul.f32 %v2308_v7, %v2806_v2  ;;  %v905_v9 = vpop.f32.mrb[19].mxu0 }
 0x112   : > { %v2859_v10 = vmul.f32 %v2806_v2, %v905_v9 }
 0x113   : > { %1659 = vxpose.xlu0.c.b16.start.end [1/1] (short) %v1656_v53, 128 }
 0x116   : > { %v2311_v12 = vpop.f32.mrb[20].mxu0 }
 0x117   : > { %v2871_v14 = vmul.f32 %v2311_v12, %v2810_v25  ;;  %v918_v2 = vpop.f32.mrb[21].mxu0 }
 0x118   : > { %v2312_v16 = vpop.f32.mrb[22].mxu0  ;;  %v2883_v20 = vmul.f32 %v2810_v25, %v918_v2 }
 0x119   : > { %v921_v17 = vpop.f32.mrb[23].mxu0  ;;  %v2886_v21 = vmul.f32 %v2312_v16, %v2810_v25 }
 0x11a   : > { %v2880_v19 = vmul.f32 %v2810_v25, %v921_v17  ;;  %v2136_v25 = vld [vmem:[%s3016_s10] ss:$0 sm:$0xff] }
 0x11e   : > { %971 = vperm.xlu1 %2455, %v965_v57  }
 0x122   : > { %981 = vperm.xlu1 %2455, %v967_v45  }
 0x126   : > { %986 = vperm.xlu1 %2455, %v968_v58  }
 0x12a   : > { %1298 = vperm.xlu1 %2455, %v2139_v62  }
 0x12e   : > { %1303 = vperm.xlu1 %2455, %v2140_v6  }
 0x132   : > { %1308 = vperm.xlu1 %2455, %v2141_v48  }
 0x136   : > { %1313 = vperm.xlu1 %2455, %v2142_v11  }
 0x138   : > { %976 = vperm.xlu0 %2454, %v966_v13  }
 0x13a   : > { %1635 = vperm.xlu1 %2455, %v2164_v15  }
 0x13c   : > { %1630 = vperm.xlu0 %2454, %v2163_v18  }
 0x13e   : > { %1645 = vperm.xlu1 %2455, %v2166_v22  }
 0x140   : > { %1640 = vperm.xlu0 %2454, %v2165_v23  }
 0x142   : > { %1587 = vperm.xlu1 %2455, %v2160_v24  }
 0x144   : > { %1259 = vperm.xlu0 %2454, %v2136_v25  }
 0x148   : > { %1919 = vperm.xlu0 %2454, %v2184_v26  }
 0x15c   : > { %v1007_v27 = vpop.trf.xlu0 }
 0x15d   : > { %2315 = vmatprep.mubr.msk.bf16.mxu1 %vm1015_vm2, %v1007_v27 }
 0x160   : > { %v1008_v28 = vpop.trf.xlu0 }
 0x161   : > { %2316 = vmatmul.mubr.msk.bf16.vlgmr.msra.gmra.mrb[12].mxu1 %vm1015_vm2, %v1008_v28 }
 0x162   : > { %2352 = vmatpush3.bf16.msra.mxu1 %v2812_v29 }
 0x163   : > { %2389 = vmatprep.subr.bf16.mxu1 %v2820_v52 }
 0x164   : > { %v1009_v30 = vpop.trf.xlu0  ;;  %v1335_v32 = vpop.trf.xlu1 }
 0x165   : > { %2319 = vmatprep.mubr.msk.bf16.mxu1 %vm1015_vm2, %v1009_v30 }
 0x168   : > { %v1010_v31 = vpop.trf.xlu0  ;;  %v1336_v37 = vpop.trf.xlu1 }
 0x169   : > { %2320 = vmatmul.mubr.msk.bf16.gmra.mrb[16].mxu1 %vm1015_vm2, %v1010_v31 }
 0x16c   : > { %v1011_v33 = vpop.trf.xlu0  ;;  %v1337_v29 = vpop.trf.xlu1 }
 0x16d   : > { %2323 = vmatprep.mubr.msk.bf16.mxu1 %vm1015_vm2, %v1011_v33 }
 0x170   : > { %v1012_v35 = vpop.trf.xlu0  ;;  %v1338_v36 = vpop.trf.xlu1 }
 0x171   : > { %2324 = vmatmul.mubr.msk.bf16.gmra.mrb[20].mxu1 %vm1015_vm2, %v1012_v35 }
 0x174   : > { %v1013_v39 = vpop.trf.xlu0  ;;  %v1339_v42 = vpop.trf.xlu1 }
 0x175   : > { %2327 = vmatprep.mubr.msk.bf16.mxu1 %vm1015_vm2, %v1013_v39 }
 0x178   : > { %v1014_v41 = vpop.trf.xlu0  ;;  %v1340_v43 = vpop.trf.xlu1 }
 0x179   : > { %2328 = vmatmul.mubr.msk.bf16.gmra.mrb[24].mxu1 %vm1015_vm2, %v1014_v41 }
 0x17a   : > { %2353 = vmatprep.mubr.msk.bf16.mxu1 %vm1015_vm2, %v1335_v32 }
 0x17c   : > { %v1667_v40 = vpop.trf.xlu0  ;;  %v1341_v46 = vpop.trf.xlu1 }
 0x180   : > { %v1668_v44 = vpop.trf.xlu0  ;;  %v1342_v50 = vpop.trf.xlu1 }
 0x181   : > { %2354 = vmatmul.mubr.msk.bf16.vlgmr.msra.gmra.mrb[28].mxu1 %vm1015_vm2, %v1336_v37 }
 0x182   : > { %2390 = vmatpush3.bf16.msra.mxu1 %v2820_v52  ;;  %2357 = vmatprep.mubr.msk.bf16.mxu1 %vm1015_vm2, %v1337_v29  ;;  %v2119_v52 = vsel %vm938_vm3, 1.0, %v2590_v0 }
 0x184   : > { %v1669_v47 = vpop.trf.xlu0 }
 0x188   : > { %v1670_v51 = vpop.trf.xlu0 }
 0x189   : > { %2358 = vmatmul.mubr.msk.bf16.gmra.mrb[32].mxu1 %vm1015_vm2, %v1338_v36 }
 0x18a   : > { %2361 = vmatprep.mubr.msk.bf16.mxu1 %vm1015_vm2, %v1339_v42 }
 0x18c   : > { %v1671_v56 = vpop.trf.xlu0 }
 0x190   : > { %v1672_v61 = vpop.trf.xlu0 }
 0x191   : > { %2362 = vmatmul.mubr.msk.bf16.gmra.mrb[36].mxu1 %vm1015_vm2, %v1340_v43 }
 0x192   : > { %2365 = vmatprep.mubr.msk.bf16.mxu1 %vm1015_vm2, %v1341_v46 }
 0x199   : > { %2366 = vmatmul.mubr.msk.bf16.gmra.mrb[40].mxu1 %vm1015_vm2, %v1342_v50 }
 0x19a   : > { %2391 = vmatprep.mubr.msk.bf16.mxu1 %vm1015_vm2, %v1667_v40 }
 0x19d   : > { %v972_v53 = vpop.permute.xlu1 %971 }
 0x19e   : > { %v989_v54 = vadd.f32 %v972_v53, %v2829_v38 }
 0x1a0   : > { %v993_v57 = vmul.f32 %v2119_v52, %v989_v54 }
 0x1a1   : > { %v982_v45 = vpop.permute.xlu1 %981  ;;  %2392 = vmatmul.mubr.msk.bf16.vlgmr.msra.gmra.mrb[44].mxu1 %vm1015_vm2, %v1668_v44 }
 0x1a2   : > { %v991_v58 = vadd.f32 %v982_v45, %v2823_v55  ;;  %2395 = vmatprep.mubr.msk.bf16.mxu1 %vm1015_vm2, %v1669_v47  ;;  %v1673_v55 = vpop.trf.xlu0 }
 0x1a4   : > { %v2929_v34 = vmul.f32 %v2119_v52, %v991_v58 }
 0x1a5   : > { %v987_v59 = vpop.permute.xlu1 %986 }
 0x1a6   : > { %v992_v62 = vadd.f32 %v987_v59, %v2838_v60  ;;  %v1674_v11 = vpop.trf.xlu0 }
 0x1a8   : > { %v2932_v63 = vmul.f32 %v2119_v52, %v992_v62 }
 0x1a9   : > { %v1299_v0 = vpop.permute.xlu1 %1298  ;;  %2396 = vmatmul.mubr.msk.bf16.gmra.mrb[48].mxu1 %vm1015_vm2, %v1670_v51 }
 0x1aa   : > { %v1202_v38 = vpack.c.bf16 %v2932_v63, %v2929_v34  ;;  %v1316_v1 = vadd.f32 %v1299_v0, %v2844_v3  ;;  %2399 = vmatprep.mubr.msk.bf16.mxu1 %vm1015_vm2, %v1671_v56 }
 0x1ac   : > { %v2939_v6 = vmul.f32 %v2119_v52, %v1316_v1 }
 0x1ad   : > { %v1304_v7 = vpop.permute.xlu1 %1303 }
 0x1ae   : > { %v1317_v9 = vadd.f32 %v1304_v7, %v2859_v10 }
 0x1b0   : > { %v2942_v48 = vmul.f32 %v2119_v52, %v1317_v9 }
 0x1b1   : > { %v1309_v60 = vpop.permute.xlu1 %1308  ;;  %2400 = vmatmul.mubr.msk.bf16.gmra.mrb[52].mxu1 %vm1015_vm2, %v1672_v61 }
 0x1b2   : > { %v1318_v12 = vadd.f32 %v1309_v60, %v2850_v5  ;;  %2403 = vmatprep.mubr.msk.bf16.mxu1 %vm1015_vm2, %v1673_v55  ;;  %v1528_v3 = vpack.c.bf16 %v2942_v48, %v2939_v6 }
 0x1b4   : > { %v2949_v13 = vmul.f32 %v2119_v52, %v1318_v12 }
 0x1b5   : > { %v1314_v2 = vpop.permute.xlu1 %1313 }
 0x1b6   : > { %v1319_v15 = vadd.f32 %v1314_v2, %v2856_v8 }
 0x1b7   : > { %v977_v16 = vpop.permute.xlu0 %976 }
 0x1b8   : > { %v2952_v10 = vmul.f32 %v2119_v52, %v1319_v15  ;;  %v990_v17 = vadd.f32 %v977_v16, %v2847_v4 }
 0x1b9   : > { %v1636_v18 = vpop.permute.xlu1 %1635  ;;  %2404 = vmatmul.mubr.msk.bf16.gmra.mrb[56].mxu1 %vm1015_vm2, %v1674_v11 }
 0x1ba   : > { %v1529_v5 = vpack.c.bf16 %v2952_v10, %v2949_v13  ;;  %v994_v22 = vmul.f32 %v2119_v52, %v990_v17  ;;  %v1649_v23 = vadd.f32 %v1636_v18, %v2880_v19 }
 0x1bb   : > { %v1631_v24 = vpop.permute.xlu0 %1630 }
 0x1bc   : > { %v2959_v25 = vmul.f32 %v2119_v52, %v1649_v23  ;;  %v1648_v26 = vadd.f32 %v1631_v24, %v2883_v20  ;;  %v1201_v8 = vpack.c.bf16 %v994_v22, %v993_v57 }
 0x1bd   : > { %v1646_v27 = vpop.permute.xlu1 %1645 }
 0x1be   : > { %v2962_v28 = vmul.f32 %v2119_v52, %v1648_v26  ;;  %v1651_v4 = vadd.f32 %v1646_v27, %v2886_v21  ;;  %2347 = vmatprep.mubr.bf16.mxu0 %v1201_v8 }
 0x1bf   : > { %v1641_v30 = vpop.permute.xlu0 %1640 }
 0x1c0   : > { %v2965_v31 = vmul.f32 %v2119_v52, %v1651_v4  ;;  %v1650_v32 = vadd.f32 %v1641_v30, %v2871_v14  ;;  %v1860_v19 = vpack.c.bf16 %v2959_v25, %v2962_v28 }
 0x1c2   : > { %v2970_v33 = vmul.f32 %v2119_v52, %v1650_v32 }
 0x1c4   : > { %v1861_v20 = vpack.c.bf16 %v2965_v31, %v2970_v33 }
 0x234   : > { %v2317_v35 = vpop.f32.mrb[12].mxu1 }
 0x235   : > { %v1074_v37 = vpop.f32.mrb[13].mxu1 }
 0x236   : > { %v2318_v39 = vpop.f32.mrb[14].mxu1 }
 0x237   : > { %v1138_v29 = vpack.c.bf16 %v2318_v39, %v2317_v35  ;;  %v1077_v41 = vpop.f32.mrb[15].mxu1 }
 0x238   : > { %v1137_v21 = vpack.c.bf16 %v1077_v41, %v1074_v37 }
 0x239   : > { %v2129_v36 = vmul.bf16 3216621497, %v1138_v29 }
 0x23a   : > { %v2128_v42 = vmul.bf16 3216621497, %v1137_v21 }
 0x23b   : > { %2470 = vpow.bf16 %v2129_v36 }
 0x23c   : > { %2472 = vpow.bf16 %v2128_v42  ;;  %v2321_v40 = vpop.f32.mrb[16].mxu1 }
 0x23d   : > { %v1090_v14 = vpop.f32.mrb[17].mxu1 }
 0x23e   : > { %v2322_v43 = vpop.f32.mrb[18].mxu1 }
 0x23f   : > { %v1140_v44 = vpack.c.bf16 %v2322_v43, %v2321_v40  ;;  %v1093_v46 = vpop.f32.mrb[19].mxu1 }
 0x240   : > { %v1139_v47 = vpack.c.bf16 %v1093_v46, %v1090_v14 }
 0x241   : > { %v2131_v49 = vmul.bf16 3216621497, %v1140_v44 }
 0x242   : > { %v2130_v50 = vmul.bf16 3216621497, %v1139_v47 }
 0x243   : > { %2474 = vpow.bf16 %v2131_v49 }
 0x244   : > { %2476 = vpow.bf16 %v2130_v50  ;;  %v2325_v51 = vpop.f32.mrb[20].mxu1 }
 0x245   : > { %v1106_v52 = vpop.f32.mrb[21].mxu1 }
 0x246   : > { %v2471_v53 = vpop.eup %2470  ;;  %v2326_v54 = vpop.f32.mrb[22].mxu1 }
 0x247   : > { %v2473_v56 = vpop.eup %2472  ;;  %v1178_v57 = vadd.bf16 1065369472, %v2471_v53  ;;  %v1142_v45 = vpack.c.bf16 %v2326_v54, %v2325_v51  ;;  %v1109_v58 = vpop.f32.mrb[23].mxu1 }
 0x248   : > { %v1177_v59 = vadd.bf16 1065369472, %v2473_v56  ;;  %v1141_v61 = vpack.c.bf16 %v1109_v58, %v1106_v52 }
 0x249   : > { %2478 = vrcp.bf16 %v1178_v57  ;;  %v2133_v62 = vmul.bf16 3216621497, %v1142_v45 }
 0x24a   : > { %2480 = vrcp.bf16 %v1177_v59  ;;  %v2132_v0 = vmul.bf16 3216621497, %v1141_v61 }
 0x24b   : > { %2482 = vpow.bf16 %v2133_v62 }
 0x24c   : > { %2484 = vpow.bf16 %v2132_v0  ;;  %v2329_v1 = vpop.f32.mrb[24].mxu1 }
 0x24d   : > { %v1122_v55 = vpop.f32.mrb[25].mxu1 }
 0x24e   : > { %v2475_v7 = vpop.eup %2474  ;;  %v2330_v9 = vpop.f32.mrb[26].mxu1 }
 0x24f   : > { %v2477_v60 = vpop.eup %2476  ;;  %v1180_v11 = vadd.bf16 1065369472, %v2475_v7  ;;  %v1144_v12 = vpack.c.bf16 %v2330_v9, %v2329_v1  ;;  %v1125_v2 = vpop.f32.mrb[27].mxu1 }
 0x250   : > { %v1179_v15 = vadd.bf16 1065369472, %v2477_v60  ;;  %v1143_v16 = vpack.c.bf16 %v1125_v2, %v1122_v55 }
 0x251   : > { %2486 = vrcp.bf16 %v1180_v11  ;;  %v2135_v17 = vmul.bf16 3216621497, %v1144_v12 }
 0x252   : > { %2488 = vrcp.bf16 %v1179_v15  ;;  %v2134_v18 = vmul.bf16 3216621497, %v1143_v16 }
 0x253   : > { %2490 = vpow.bf16 %v2135_v17 }
 0x254   : > { %v2479_v22 = vpop.eup %2478  ;;  %2492 = vpow.bf16 %v2134_v18  ;;  %v2355_v23 = vpop.f32.mrb[28].mxu1 }
 0x255   : > { %v2481_v24 = vpop.eup %2480  ;;  %v1401_v26 = vpop.f32.mrb[29].mxu1  ;;  %v1188_v41 = vmul.bf16 1065369472, %v2479_v22 }
 0x256   : > { %v2483_v8 = vpop.eup %2482  ;;  %v2356_v27 = vpop.f32.mrb[30].mxu1  ;;  %v1186_v4 = vmul.bf16 1065369472, %v2481_v24 }
 0x257   : > { %v2485_v30 = vpop.eup %2484  ;;  %v1182_v32 = vadd.bf16 1065369472, %v2483_v8  ;;  %v1465_v35 = vpack.c.bf16 %v2356_v27, %v2355_v23  ;;  %v1404_v37 = vpop.f32.mrb[31].mxu1 }
 0x258   : > { %v1181_v39 = vadd.bf16 1065369472, %v2485_v30  ;;  %v1464_v29 = vpack.c.bf16 %v1404_v37, %v1401_v26  ;;  %2331 = vmatprep.subr.bf16.mxu0 %v1186_v4 }
 0x259   : > { %2494 = vrcp.bf16 %v1182_v32  ;;  %v2152_v21 = vmul.bf16 3216621497, %v1465_v35  ;;  %2332 = vmatpush3.bf16.msra.mxu0 %v1186_v4 }
 0x25a   : > { %2496 = vrcp.bf16 %v1181_v39  ;;  %v2151_v36 = vmul.bf16 3216621497, %v1464_v29  ;;  %2333 = vmatprep.subr.bf16.mxu0 %v1188_v41 }
 0x25b   : > { %2498 = vpow.bf16 %v2152_v21 }
 0x25c   : > { %v2487_v42 = vpop.eup %2486  ;;  %2500 = vpow.bf16 %v2151_v36  ;;  %v2359_v40 = vpop.f32.mrb[32].mxu1 }
 0x25d   : > { %v2489_v14 = vpop.eup %2488  ;;  %2334 = vmatpush3.bf16.msra.mxu0 %v1188_v41  ;;  %v1417_v43 = vpop.f32.mrb[33].mxu1  ;;  %v1192_v56 = vmul.bf16 1065369472, %v2487_v42 }
 0x25e   : > { %v2491_v44 = vpop.eup %2490  ;;  %v2360_v46 = vpop.f32.mrb[34].mxu1  ;;  %v1190_v47 = vmul.bf16 1065369472, %v2489_v14 }
 0x25f   : > { %v2493_v49 = vpop.eup %2492  ;;  %v1184_v50 = vadd.bf16 1065369472, %v2491_v44  ;;  %v1467_v51 = vpack.c.bf16 %v2360_v46, %v2359_v40  ;;  %v1420_v52 = vpop.f32.mrb[35].mxu1 }
 0x260   : > { %v1183_v53 = vadd.bf16 1065369472, %v2493_v49  ;;  %v1466_v54 = vpack.c.bf16 %v1420_v52, %v1417_v43  ;;  %2335 = vmatprep.subr.bf16.mxu0 %v1190_v47 }
 0x261   : > { %2502 = vrcp.bf16 %v1184_v50  ;;  %v2154_v57 = vmul.bf16 3216621497, %v1467_v51  ;;  %2336 = vmatpush3.bf16.msra.mxu0 %v1190_v47 }
 0x262   : > { %2504 = vrcp.bf16 %v1183_v53  ;;  %v2153_v45 = vmul.bf16 3216621497, %v1466_v54  ;;  %2337 = vmatprep.subr.bf16.mxu0 %v1192_v56 }
 0x263   : > { %2506 = vpow.bf16 %v2154_v57 }
 0x264   : > { %v2495_v58 = vpop.eup %2494  ;;  %2508 = vpow.bf16 %v2153_v45  ;;  %v2363_v59 = vpop.f32.mrb[36].mxu1 }
 0x265   : > { %v2497_v61 = vpop.eup %2496  ;;  %2338 = vmatpush3.bf16.msra.mxu0 %v1192_v56  ;;  %v1433_v62 = vpop.f32.mrb[37].mxu1  ;;  %v1196_v15 = vmul.bf16 1065369472, %v2495_v58 }
 0x266   : > { %v2499_v0 = vpop.eup %2498  ;;  %v2364_v1 = vpop.f32.mrb[38].mxu1  ;;  %v1194_v55 = vmul.bf16 1065369472, %v2497_v61 }
 0x267   : > { %v2501_v7 = vpop.eup %2500  ;;  %v1505_v9 = vadd.bf16 1065369472, %v2499_v0  ;;  %v1469_v60 = vpack.c.bf16 %v2364_v1, %v2363_v59  ;;  %v1436_v11 = vpop.f32.mrb[39].mxu1 }
 0x268   : > { %v1504_v12 = vadd.bf16 1065369472, %v2501_v7  ;;  %v1468_v2 = vpack.c.bf16 %v1436_v11, %v1433_v62  ;;  %2339 = vmatprep.subr.bf16.mxu0 %v1194_v55 }
 0x269   : > { %2510 = vrcp.bf16 %v1505_v9  ;;  %v2156_v16 = vmul.bf16 3216621497, %v1469_v60  ;;  %2340 = vmatpush3.bf16.msra.mxu0 %v1194_v55 }
 0x26a   : > { %2512 = vrcp.bf16 %v1504_v12  ;;  %v2155_v17 = vmul.bf16 3216621497, %v1468_v2  ;;  %2341 = vmatprep.subr.bf16.mxu0 %v1196_v15 }
 0x26b   : > { %2514 = vpow.bf16 %v2156_v16 }
 0x26c   : > { %v2503_v18 = vpop.eup %2502  ;;  %2516 = vpow.bf16 %v2155_v17  ;;  %v2367_v22 = vpop.f32.mrb[40].mxu1 }
 0x26d   : > { %v2505_v23 = vpop.eup %2504  ;;  %2342 = vmatpush3.bf16.msra.mxu0 %v1196_v15  ;;  %v1449_v24 = vpop.f32.mrb[41].mxu1  ;;  %v1200_v29 = vmul.bf16 1065369472, %v2503_v18 }
 0x26e   : > { %v2507_v26 = vpop.eup %2506  ;;  %v2368_v8 = vpop.f32.mrb[42].mxu1  ;;  %v1198_v27 = vmul.bf16 1065369472, %v2505_v23 }
 0x26f   : > { %v2509_v4 = vpop.eup %2508  ;;  %v1507_v30 = vadd.bf16 1065369472, %v2507_v26  ;;  %v1471_v32 = vpack.c.bf16 %v2368_v8, %v2367_v22  ;;  %v1452_v35 = vpop.f32.mrb[43].mxu1 }
 0x270   : > { %v1506_v37 = vadd.bf16 1065369472, %v2509_v4  ;;  %v1470_v39 = vpack.c.bf16 %v1452_v35, %v1449_v24  ;;  %2343 = vmatprep.subr.bf16.mxu0 %v1198_v27 }
 0x271   : > { %2518 = vrcp.bf16 %v1507_v30  ;;  %v2158_v41 = vmul.bf16 3216621497, %v1471_v32  ;;  %2344 = vmatpush3.bf16.msra.mxu0 %v1198_v27 }
 0x272   : > { %2520 = vrcp.bf16 %v1506_v37  ;;  %v2157_v21 = vmul.bf16 3216621497, %v1470_v39  ;;  %2345 = vmatprep.subr.bf16.mxu0 %v1200_v29 }
 0x273   : > { %2522 = vpow.bf16 %v2158_v41 }
 0x274   : > { %v2511_v36 = vpop.eup %2510  ;;  %2524 = vpow.bf16 %v2157_v21  ;;  %v2393_v42 = vpop.f32.mrb[44].mxu1 }
 0x275   : > { %v2513_v40 = vpop.eup %2512  ;;  %2346 = vmatpush3.bf16.msra.mxu0 %v1200_v29  ;;  %v1733_v14 = vpop.f32.mrb[45].mxu1  ;;  %v1515_v54 = vmul.bf16 1065369472, %v2511_v36 }
 0x276   : > { %v2515_v43 = vpop.eup %2514  ;;  %v2394_v44 = vpop.f32.mrb[46].mxu1  ;;  %v1513_v46 = vmul.bf16 1065369472, %v2513_v40 }
 0x277   : > { %v2517_v47 = vpop.eup %2516  ;;  %v1509_v49 = vadd.bf16 1065369472, %v2515_v43  ;;  %v1797_v50 = vpack.c.bf16 %v2394_v44, %v2393_v42  ;;  %v1736_v51 = vpop.f32.mrb[47].mxu1 }
 0x278   : > { %v1508_v52 = vadd.bf16 1065369472, %v2517_v47  ;;  %v1796_v53 = vpack.c.bf16 %v1736_v51, %v1733_v14  ;;  %2348 = vmatmul.mubr.bf16.vlgmr.msra.gmra.mrb[24].mxu0 %v1202_v38  ;;  %2369 = vmatprep.subr.bf16.mxu0 %v1513_v46 }
 0x279   : > { %2526 = vrcp.bf16 %v1509_v49  ;;  %v2176_v56 = vmul.bf16 3216621497, %v1797_v50  ;;  %2370 = vmatpush3.bf16.msra.mxu0 %v1513_v46  ;;  %2385 = vmatprep.mubr.bf16.mxu0 %v1528_v3 }
 0x27a   : > { %2528 = vrcp.bf16 %v1508_v52  ;;  %v2175_v57 = vmul.bf16 3216621497, %v1796_v53  ;;  %2371 = vmatprep.subr.bf16.mxu0 %v1515_v54 }
 0x27b   : > { %2530 = vpow.bf16 %v2176_v56 }
 0x27c   : > { %v2519_v45 = vpop.eup %2518  ;;  %2532 = vpow.bf16 %v2175_v57  ;;  %v2397_v58 = vpop.f32.mrb[48].mxu1 }
 0x27d   : > { %v2521_v59 = vpop.eup %2520  ;;  %2372 = vmatpush3.bf16.msra.mxu0 %v1515_v54  ;;  %v1749_v34 = vpop.f32.mrb[49].mxu1  ;;  %v1519_v48 = vmul.bf16 1065369472, %v2519_v45 }
 0x27e   : > { %v2523_v63 = vpop.eup %2522  ;;  %v2398_v38 = vpop.f32.mrb[50].mxu1  ;;  %v1517_v61 = vmul.bf16 1065369472, %v2521_v59 }
 0x27f   : > { %v2525_v62 = vpop.eup %2524  ;;  %v1511_v0 = vadd.bf16 1065369472, %v2523_v63  ;;  %v1799_v1 = vpack.c.bf16 %v2398_v38, %v2397_v58  ;;  %v1752_v55 = vpop.f32.mrb[51].mxu1 }
 0x280   : > { %v1510_v7 = vadd.bf16 1065369472, %v2525_v62  ;;  %v1798_v6 = vpack.c.bf16 %v1752_v55, %v1749_v34  ;;  %2373 = vmatprep.subr.bf16.mxu0 %v1517_v61 }
 0x281   : > { %2534 = vrcp.bf16 %v1511_v0  ;;  %v2178_v3 = vmul.bf16 3216621497, %v1799_v1  ;;  %2374 = vmatpush3.bf16.msra.mxu0 %v1517_v61 }
 0x282   : > { %2536 = vrcp.bf16 %v1510_v7  ;;  %v2177_v9 = vmul.bf16 3216621497, %v1798_v6  ;;  %2375 = vmatprep.subr.bf16.mxu0 %v1519_v48 }
 0x283   : > { %2538 = vpow.bf16 %v2178_v3 }
 0x284   : > { %v2527_v60 = vpop.eup %2526  ;;  %2540 = vpow.bf16 %v2177_v9  ;;  %v2401_v11 = vpop.f32.mrb[52].mxu1 }
 0x285   : > { %v2529_v12 = vpop.eup %2528  ;;  %2376 = vmatpush3.bf16.msra.mxu0 %v1519_v48  ;;  %v1765_v2 = vpop.f32.mrb[53].mxu1  ;;  %v1523_v27 = vmul.bf16 1065369472, %v2527_v60 }
 0x286   : > { %v2531_v15 = vpop.eup %2530  ;;  %v2402_v16 = vpop.f32.mrb[54].mxu1  ;;  %v1521_v17 = vmul.bf16 1065369472, %v2529_v12 }
 0x287   : > { %v2533_v18 = vpop.eup %2532  ;;  %v1837_v22 = vadd.bf16 1065369472, %v2531_v15  ;;  %v1801_v23 = vpack.c.bf16 %v2402_v16, %v2401_v11  ;;  %v1768_v24 = vpop.f32.mrb[55].mxu1 }
 0x288   : > { %v1836_v26 = vadd.bf16 1065369472, %v2533_v18  ;;  %v1800_v8 = vpack.c.bf16 %v1768_v24, %v1765_v2  ;;  %2377 = vmatprep.subr.bf16.mxu0 %v1521_v17  ;;  %v1588_v9 = vpop.permute.xlu1 %1587  ;;  %v1260_v60 = vpop.permute.xlu0 %1259 }
 0x289   : > { %2542 = vrcp.bf16 %v1837_v22  ;;  %v2180_v4 = vmul.bf16 3216621497, %v1801_v23  ;;  %2378 = vmatpush3.bf16.msra.mxu0 %v1521_v17 }
 0x28a   : > { %2544 = vrcp.bf16 %v1836_v26  ;;  %v2179_v30 = vmul.bf16 3216621497, %v1800_v8  ;;  %2379 = vmatprep.subr.bf16.mxu0 %v1523_v27 }
 0x28b   : > { %2546 = vpow.bf16 %v2180_v4 }
 0x28c   : > { %v2535_v32 = vpop.eup %2534  ;;  %2548 = vpow.bf16 %v2179_v30  ;;  %v2405_v35 = vpop.f32.mrb[56].mxu1 }
 0x28d   : > { %v2537_v37 = vpop.eup %2536  ;;  %2380 = vmatpush3.bf16.msra.mxu0 %v1523_v27  ;;  %v1781_v39 = vpop.f32.mrb[57].mxu1  ;;  %v1527_v46 = vmul.bf16 1065369472, %v2535_v32 }
 0x28e   : > { %v2539_v29 = vpop.eup %2538  ;;  %v2406_v41 = vpop.f32.mrb[58].mxu1  ;;  %v1525_v21 = vmul.bf16 1065369472, %v2537_v37  ;;  %v1932_v37 = vld [vmem:[%s2687_s28 + $0x10] sm:$0xff] }
 0x28f   : > { %v2541_v36 = vpop.eup %2540  ;;  %v1839_v42 = vadd.bf16 1065369472, %v2539_v29  ;;  %v1803_v40 = vpack.c.bf16 %v2406_v41, %v2405_v35  ;;  %v1784_v14 = vpop.f32.mrb[59].mxu1 }
 0x290   : > { %v1838_v43 = vadd.bf16 1065369472, %v2541_v36  ;;  %v1802_v44 = vpack.c.bf16 %v1784_v14, %v1781_v39  ;;  %2381 = vmatprep.subr.bf16.mxu0 %v1525_v21  ;;  %v1920_v4 = vpop.permute.xlu0 %1919  ;;  %v1933_v14 = vld [vmem:[%s2687_s28 + $0x18] sm:$0xff] }
 0x291   : > { %2550 = vrcp.bf16 %v1839_v42  ;;  %v2182_v47 = vmul.bf16 3216621497, %v1803_v40  ;;  %2382 = vmatpush3.bf16.msra.mxu0 %v1525_v21  ;;  %v1930_v21 = vld [vmem:[%s2687_s28] sm:$0xff] }
 0x292   : > { %2552 = vrcp.bf16 %v1838_v43  ;;  %v2181_v49 = vmul.bf16 3216621497, %v1802_v44  ;;  %2383 = vmatprep.subr.bf16.mxu0 %v1527_v46 }
 0x293   : > { %2554 = vpow.bf16 %v2182_v47  ;;  %v1931_v47 = vld [vmem:[%s2687_s28 + $0x8] sm:$0xff] }
 0x294   : > { %v2543_v50 = vpop.eup %2542  ;;  %2556 = vpow.bf16 %v2181_v49 }
 0x295   : > { %v2545_v51 = vpop.eup %2544  ;;  %2384 = vmatpush3.bf16.msra.mxu0 %v1527_v46  ;;  %v1847_v45 = vmul.bf16 1065369472, %v2543_v50 }
 0x296   : > { %v2547_v52 = vpop.eup %2546  ;;  %v1845_v53 = vmul.bf16 1065369472, %v2545_v51 }
 0x297   : > { %v2549_v54 = vpop.eup %2548  ;;  %v1841_v56 = vadd.bf16 1065369472, %v2547_v52 }
 0x298   : > { %v1840_v57 = vadd.bf16 1065369472, %v2549_v54  ;;  %2386 = vmatmul.mubr.bf16.vlgmr.msra.gmra.mrb[28].mxu0 %v1529_v5  ;;  %2407 = vmatprep.subr.bf16.mxu0 %v1845_v53 }
 0x299   : > { %2558 = vrcp.bf16 %v1841_v56  ;;  %2408 = vmatpush3.bf16.msra.mxu0 %v1845_v53  ;;  %2423 = vmatprep.mubr.bf16.mxu0 %v1860_v19 }
 0x29a   : > { %2560 = vrcp.bf16 %v1840_v57  ;;  %2409 = vmatprep.subr.bf16.mxu0 %v1847_v45 }
 0x29c   : > { %v2551_v58 = vpop.eup %2550 }
 0x29d   : > { %v2553_v59 = vpop.eup %2552  ;;  %2410 = vmatpush3.bf16.msra.mxu0 %v1847_v45  ;;  %v1851_v13 = vmul.bf16 1065369472, %v2551_v58 }
 0x29e   : > { %v2555_v34 = vpop.eup %2554  ;;  %v1849_v63 = vmul.bf16 1065369472, %v2553_v59 }
 0x29f   : > { %v2557_v38 = vpop.eup %2556  ;;  %v1843_v61 = vadd.bf16 1065369472, %v2555_v34 }
 0x2a0   : > { %v1842_v62 = vadd.bf16 1065369472, %v2557_v38  ;;  %2411 = vmatprep.subr.bf16.mxu0 %v1849_v63 }
 0x2a1   : > { %2562 = vrcp.bf16 %v1843_v61  ;;  %2412 = vmatpush3.bf16.msra.mxu0 %v1849_v63 }
 0x2a2   : > { %2564 = vrcp.bf16 %v1842_v62  ;;  %2413 = vmatprep.subr.bf16.mxu0 %v1851_v13 }
 0x2a4   : > { %v2559_v10 = vpop.eup %2558 }
 0x2a5   : > { %v2561_v5 = vpop.eup %2560  ;;  %2414 = vmatpush3.bf16.msra.mxu0 %v1851_v13  ;;  %v1855_v28 = vmul.bf16 1065369472, %v2559_v10 }
 0x2a6   : > { %v1853_v25 = vmul.bf16 1065369472, %v2561_v5 }
 0x2a8   : > { %2415 = vmatprep.subr.bf16.mxu0 %v1853_v25 }
 0x2a9   : > { %2416 = vmatpush3.bf16.msra.mxu0 %v1853_v25 }
 0x2aa   : > { %2417 = vmatprep.subr.bf16.mxu0 %v1855_v28 }
 0x2ac   : > { %v2563_v19 = vpop.eup %2562 }
 0x2ad   : > { %v2565_v0 = vpop.eup %2564  ;;  %2418 = vmatpush3.bf16.msra.mxu0 %v1855_v28  ;;  %v1859_v55 = vmul.bf16 1065369472, %v2563_v19 }
 0x2ae   : > { %v1857_v1 = vmul.bf16 1065369472, %v2565_v0 }
 0x2b0   : > { %2419 = vmatprep.subr.bf16.mxu0 %v1857_v1 }
 0x2b1   : > { %2420 = vmatpush3.bf16.msra.mxu0 %v1857_v1 }
 0x2b2   : > { %2421 = vmatprep.subr.bf16.mxu0 %v1859_v55 }
 0x2b5   : > { %2422 = vmatpush3.bf16.msra.mxu0 %v1859_v55 }
 0x2b8   : > { %2424 = vmatmul.mubr.bf16.vlgmr.msra.gmra.mrb[32].mxu0 %v1861_v20 }
 0x34b   : > { %v2349_v7 = vpop.f32.mrb[24].mxu0 }
 0x34c   : > { %v1237_v6 = vpop.f32.mrb[25].mxu0  ;;  %v1264_v12 = vmul.f32 %v2349_v7, %v1260_v60 }
 0x34d   : > { %v2350_v48 = vpop.f32.mrb[26].mxu0  ;;  %v1262_v16 = vmul.f32 %v1260_v60, %v1237_v6 }
 0x34e   : > { %v1240_v3 = vpop.f32.mrb[27].mxu0  ;;  %v1265_v22 = vmul.f32 %v2350_v48, %v1260_v60 }
 0x34f   : > { %v1263_v33 = vmul.f32 %v1260_v60, %v1240_v3 }
 0x36b   : > { %v2387_v11 = vpop.f32.mrb[28].mxu0 }
 0x36c   : > { %v1592_v2 = vmul.f32 %v2387_v11, %v1588_v9  ;;  %v1564_v15 = vpop.f32.mrb[29].mxu0 }
 0x36d   : > { %v1590_v17 = vmul.f32 %v1588_v9, %v1564_v15  ;;  %v2388_v18 = vpop.f32.mrb[30].mxu0 }
 0x36e   : > { %v1596_v23 = vadd.f32 %v1592_v2, %v1264_v12  ;;  %v1593_v24 = vmul.f32 %v2388_v18, %v1588_v9  ;;  %v1567_v31 = vpop.f32.mrb[31].mxu0 }
 0x36f   : > { %v1594_v20 = vadd.f32 %v1590_v17, %v1262_v16  ;;  %v1591_v26 = vmul.f32 %v1588_v9, %v1567_v31 }
 0x370   : > { %v1597_v8 = vadd.f32 %v1593_v24, %v1265_v22 }
 0x371   : > { %v1595_v27 = vadd.f32 %v1591_v26, %v1263_v33 }
 0x38b   : > { %v2425_v30 = vpop.f32.mrb[32].mxu0 }
 0x38c   : > { %v1924_v32 = vmul.f32 %v2425_v30, %v1920_v4  ;;  %v1896_v35 = vpop.f32.mrb[33].mxu0 }
 0x38d   : > { %v1922_v39 = vmul.f32 %v1920_v4, %v1896_v35  ;;  %v2426_v29 = vpop.f32.mrb[34].mxu0 }
 0x38e   : > { %v1928_v41 = vadd.f32 %v1924_v32, %v1596_v23  ;;  %v1925_v36 = vmul.f32 %v2426_v29, %v1920_v4  ;;  %v1899_v42 = vpop.f32.mrb[35].mxu0 }
 0x38f   : > { %v1926_v40 = vadd.f32 %v1922_v39, %v1594_v20  ;;  %v1923_v43 = vmul.f32 %v1920_v4, %v1899_v42 }
 0x390   : > { %v1936_v44 = vadd.f32 %v1932_v37, %v1928_v41  ;;  %v1929_v46 = vadd.f32 %v1925_v36, %v1597_v8 }
 0x391   : > { %v1934_v49 = vadd.f32 %v1930_v21, %v1926_v40  ;;  %v1927_v50 = vadd.f32 %v1923_v43, %v1595_v27 }
 0x392   : > { %1940 = vst [vmem:[%s2687_s28 + $0x10] sm:$0xff] %v1936_v44  ;;  %v1937_v51 = vadd.f32 %v1933_v14, %v1929_v46 }
 0x393   : > { %1938 = vst [vmem:[%s2687_s28] sm:$0xff] %v1934_v49  ;;  %v1935_v52 = vadd.f32 %v1931_v47, %v1927_v50 }
 0x394   : > { %1941 = vst [vmem:[%s2687_s28 + $0x18] sm:$0xff] %v1937_v51 }
 0x395   : > { %1939 = vst [vmem:[%s2687_s28 + $0x8] sm:$0xff] %v1935_v52 }
 0x396 PF: > { %s21_s19 = sadd.s32 1, %s2588_s19   ;;  %s3018_s17 = smov %s2584_s18 }
 0x397   : > { %p18_p5 = scmp.ge.s32.totalorder %s21_s19, 4   ;;  %s3019_s18 = smov %s3021_s20 }
 0x399   :  { %20 = sbr.rel (!%p18_p5) target bundleno = 2 (0x2), region = 119 }

</bundles_post_ra>
